<compile_context>
chip_gen: v7x
topology: tpu7x:2x2x1
jax: 0.10.0
libtpu: 0.0.40
codegen_flags: <defaults>
</compile_context>

<pallas_src>
import jax
import jax.numpy as jnp
from jax import lax
from jax.experimental import pallas as pl
from jax.experimental.pallas import tpu as pltpu

_EPS = 1e-5


def _vmem_capacity_bytes():
    try:
        info = pltpu.get_tpu_info()
        for attr in ("vmem_capacity_bytes", "vmem_size_bytes", "vmem_bytes"):
            v = getattr(info, attr, None)
            if v:
                return int(v)
    except Exception:
        pass
    return 64 << 20  # conservative (v7x per-TC)


# ---------------------------------------------------------------------------
# factored depthwise 3x3 on the flattened (.., C, H*W) layout: 4 rolls total
# ---------------------------------------------------------------------------
def _dwconv3x3(x, mw_ref, W, HW):
    """x: (bn, bc, HW) f32; mw_ref: (9, bc, HW) per-tap (weight * mask), taps in
    row-major (dh, dw) order.  The two +/-1 column shifts are shared by all
    three rows; the dh = +/-1 row results are then rolled by -/+W, with the
    top/bottom border masks already folded into mw."""
    xm = pltpu.roll(x, 1, 2)               # x[p-1]  -> dw = -1 taps
    xp = pltpu.roll(x, (HW - 1) % HW, 2)   # x[p+1]  -> dw = +1 taps

    def row(r):
        b = 3 * r
        return (xm * mw_ref[b + 0][None] + x * mw_ref[b + 1][None]
                + xp * mw_ref[b + 2][None])

    r_m1 = row(0)                          # dh = -1 (needs x[h-1, :])
    r_0 = row(1)
    r_p1 = row(2)                          # dh = +1
    return (r_0 + pltpu.roll(r_m1, W % HW, 2)
            + pltpu.roll(r_p1, (HW - W) % HW, 2))


def _fill_mw(mw_ref, w3_ref, fmask_ref):
    # mw is constant across the inner ni grid axis -> refresh only on ni == 0.
    @pl.when(pl.program_id(1) == 0)
    def _():
        for k in range(9):
            mw_ref[k] = w3_ref[k] * fmask_ref[k:k + 1, :]   # (bc,1)*(1,HW)


def _make_pass1_kernel(W, HW):
    def kernel(x_ref, w3_ref, fmask_ref, mom_ref, mw_ref):
        _fill_mw(mw_ref, w3_ref, fmask_ref)
        x = x_ref[...].astype(jnp.float32)
        a = _dwconv3x3(x, mw_ref, W, HW)
        bc = x.shape[1]

        def mom(t):  # batch reduce first (VPU adds), then lanes (XLU)
            return jnp.sum(jnp.sum(t, axis=0), axis=-1, keepdims=True)[None]

        mom_ref[:, :, 0:1] = mom(a)          # S_a
        mom_ref[:, :, 1:2] = mom(a * a)      # S_a2
        mom_ref[:, :, 2:3] = mom(x)          # S_x
        mom_ref[:, :, 3:4] = mom(x * x)      # S_x2
        mom_ref[:, :, 4:5] = mom(a * x)      # S_ax
        mom_ref[:, :, 5:8] = jnp.zeros((1, bc, 3), jnp.float32)
    return kernel


def _make_pass2_kernel(W, HW):
    def kernel(x_ref, w3_ref, fmask_ref, cst_ref, o_ref, mw_ref):
        _fill_mw(mw_ref, w3_ref, fmask_ref)
        x = x_ref[...].astype(jnp.float32)
        a = _dwconv3x3(x, mw_ref, W, HW)     # full affine folded into mw
        o_ref[...] = (a + cst_ref[...][None]).astype(o_ref.dtype)
    return kernel


# ---------------------------------------------------------------------------
# block-size selection (Mosaic needs bc == C or bc % 8 == 0)
# ---------------------------------------------------------------------------
def _choose_bc(C, HW, slab_budget):
    cands = [d for d in range(1, C + 1) if C % d == 0 and (d == C or d % 8 == 0)]
    within = [d for d in cands if d * HW * 4 <= slab_budget]
    return max(within) if within else min(cands)


def _choose_bn(N, bc, HW, tile_budget):
    cands = [d for d in range(1, N + 1) if N % d == 0]
    within = [d for d in cands if d * bc * HW * 4 <= tile_budget]
    return max(within) if within else 1


# ---------------------------------------------------------------------------
# forward
# ---------------------------------------------------------------------------
def repvggdw_forward(x_nchw, params):
    """x_nchw: (N, C, H, W) float32 (PyTorch layout). Returns (N, C, H, W)."""
    N, C, H, W = x_nchw.shape
    HW = H * W
    x = x_nchw.reshape(N, C, HW).astype(jnp.float32)

    # Factored per-tap masks (column validity x pre-roll row validity): exactly
    # reproduces zero padding of the 3x3 depthwise conv on the flat layout.
    hh = jnp.arange(H, dtype=jnp.int32)[:, None]
    ww = jnp.arange(W, dtype=jnp.int32)[None, :]
    rows = []
    for dh in (-1, 0, 1):
        if dh == -1:
            rmask = hh <= H - 2          # bottom row of r_{-1} never used
        elif dh == 1:
            rmask = hh >= 1              # top row of r_{+1} never used
        else:
            rmask = hh >= 0
        for dw in (-1, 0, 1):
            cmask = (ww + dw >= 0) & (ww + dw < W)
            rows.append((rmask & cmask).reshape(-1))
    fmask = jnp.stack(rows, axis=0).astype(jnp.float32)              # (9, HW)

    w3 = params["w3"].reshape(9, C).astype(jnp.float32)              # (9, C)

    # -- generation-aware tiling (v5e/v6e: 128 MiB VMEM, v7x: 64 MiB) ---------
    vmem_phys = _vmem_capacity_bytes()
    big = vmem_phys > (96 << 20)
    slab_budget = (768 << 10) if big else (384 << 10)   # (bc,HW) slab; mw = 9x
    tile_budget = (4 << 20) if big else (2 << 20)       # (bn,bc,HW) f32 tile
    bc = _choose_bc(C, HW, slab_budget)
    bn = _choose_bn(N, bc, HW, tile_budget)
    gc, gn = C // bc, N // bn
    tile_bytes = bn * bc * HW * 4
    mw_bytes = 9 * bc * HW * 4
    cparams = pltpu.CompilerParams(
        # The mw scratch is carried across ni -> keep that axis sequential;
        # megacore parallelism (v7x) comes from the channel axis.
        dimension_semantics=("parallel", "arbitrary"),
        vmem_limit_bytes=int(min(int(0.75 * vmem_phys),
                                 max(32 << 20, 12 * tile_bytes + 2 * mw_bytes))),
    )
    elems = N * C * HW

    # ---- pass 1: per-channel moments of (conv3x3(x), x) ---------------------
    moments = pl.pallas_call(
        _make_pass1_kernel(W, HW),
        out_shape=jax.ShapeDtypeStruct((gn, C, 8), jnp.float32),
        grid=(gc, gn),
        in_specs=[
            pl.BlockSpec((bn, bc, HW), lambda ci, ni: (ni, ci, 0)),
            pl.BlockSpec((9, bc, 1), lambda ci, ni: (0, ci, 0)),
            pl.BlockSpec((9, HW), lambda ci, ni: (0, 0)),
        ],
        out_specs=pl.BlockSpec((1, bc, 8), lambda ci, ni: (ni, ci, 0)),
        scratch_shapes=[pltpu.VMEM((9, bc, HW), jnp.float32)],
        compiler_params=cparams,
        cost_estimate=pl.CostEstimate(
            flops=42 * elems, transcendentals=0,
            bytes_accessed=4 * (elems + 9 * (C + HW) + gn * C * 8)),
    )(x, w3[:, :, None], fmask)

    # ---- fold BN1 + 1x1 conv + identity + BN2 into the conv weights ---------
    mom = jnp.sum(moments[..., :5], axis=0)              # (C, 5)
    cnt = jnp.float32(N * HW)
    s_a, s_a2, s_x, s_x2, s_ax = (mom[:, i] for i in range(5))
    mean_a = s_a / cnt
    var_a = jnp.maximum(s_a2 / cnt - mean_a * mean_a, 0.0)
    mean_x = s_x / cnt
    var_x = jnp.maximum(s_x2 / cnt - mean_x * mean_x, 0.0)
    cov_ax = s_ax / cnt - mean_a * mean_x

    g1 = params["bn1_w"].astype(jnp.float32)
    be1 = params["bn1_b"].astype(jnp.float32)
    g2 = params["bn_w"].astype(jnp.float32)
    be2 = params["bn_b"].astype(jnp.float32)
    w1p = params["w1"].astype(jnp.float32) + 1.0         # 1x1 branch + identity
    b1 = params["b1"].astype(jnp.float32)

    scale1 = g1 * lax.rsqrt(var_a + _EPS)                # inner BN (batch stats)
    c0 = (be1 - mean_a * scale1) + b1
    mean_s = scale1 * mean_a + w1p * mean_x + c0         # stats of s = y3+y1+x
    var_s = jnp.maximum(scale1 * scale1 * var_a + w1p * w1p * var_x
                        + 2.0 * scale1 * w1p * cov_ax, 0.0)
    scale2 = g2 * lax.rsqrt(var_s + _EPS)
    coef_a = scale2 * scale1                             # multiplies conv3x3(x)
    coef_b = scale2 * w1p                                # multiplies x
    coef_c = scale2 * (c0 - mean_s) + be2                # per-channel constant

    # out = A*conv(x) + B*x + C  ==  conv_{A*w3, centre tap += B}(x) + C
    w3_p2 = w3 * coef_a[None, :]
    w3_p2 = w3_p2.at[4].add(coef_b)                      # centre tap mask == 1
    cst = coef_c[:, None]                                # (C, 1)

    # ---- pass 2: recompute the re-weighted conv, add constant, store --------
    out = pl.pallas_call(
        _make_pass2_kernel(W, HW),
        out_shape=jax.ShapeDtypeStruct((N, C, HW), jnp.float32),
        grid=(gc, gn),
        in_specs=[
            pl.BlockSpec((bn, bc, HW), lambda ci, ni: (ni, ci, 0)),
            pl.BlockSpec((9, bc, 1), lambda ci, ni: (0, ci, 0)),
            pl.BlockSpec((9, HW), lambda ci, ni: (0, 0)),
            pl.BlockSpec((bc, 1), lambda ci, ni: (ci, 0)),
        ],
        out_specs=pl.BlockSpec((bn, bc, HW), lambda ci, ni: (ni, ci, 0)),
        scratch_shapes=[pltpu.VMEM((9, bc, HW), jnp.float32)],
        compiler_params=cparams,
        cost_estimate=pl.CostEstimate(
            flops=20 * elems, transcendentals=0,
            bytes_accessed=4 * (2 * elems + 9 * (C + HW) + C)),
    )(x, w3_p2[:, :, None], fmask, cst)

    return out.reshape(N, C, H, W)


# ---------------------------------------------------------------------------
# pure-JAX reference (independent implementation of the same math)
# ---------------------------------------------------------------------------
def repvggdw_reference(x_nchw, params):
    x = jnp.transpose(x_nchw, (0, 2, 3, 1)).astype(jnp.float32)
    C = x.shape[-1]
    k3 = params["w3"].reshape(3, 3, 1, C)
    y3 = lax.conv_general_dilated(
        x, k3, window_strides=(1, 1), padding="SAME",
        dimension_numbers=("NHWC", "HWIO", "NHWC"), feature_group_count=C,
        precision=lax.Precision.HIGHEST)

    def bn(y, g, b):
        m = jnp.mean(y, axis=(0, 1, 2))
        v = jnp.mean(jnp.square(y - m), axis=(0, 1, 2))
        return (y - m) * lax.rsqrt(v + _EPS) * g + b

    y3 = bn(y3, params["bn1_w"], params["bn1_b"])
    y1 = x * params["w1"] + params["b1"]
    out = bn(y3 + y1 + x, params["bn_w"], params["bn_b"])
    return jnp.transpose(out, (0, 3, 1, 2))


if __name__ == "__main__":
    N, ED, H, W = 2, 4, 16, 16  # x: (2, 4, 16, 16) NCHW, ed = 4
    key = jax.random.PRNGKey(0)
    k0, k1, k2, k3 = jax.random.split(key, 4)

    x = jax.random.normal(k0, (N, ED, H, W), jnp.float32)
    params = {
        # conv.c.weight: torch (ed, 1, 3, 3) -> stored here as (3, 3, ed)
        "w3": jax.random.normal(k1, (3, 3, ED), jnp.float32) * 0.3,
        # conv1.weight (ed,1,1,1) -> (ed,), conv1.bias (ed,)
        "w1": jax.random.normal(k2, (ED,), jnp.float32) * 0.3,
        "b1": jax.random.normal(k3, (ED,), jnp.float32) * 0.1,
        # Conv2d_BN's bn: weight init to 1, bias to 0 (per module __init__)
        "bn1_w": jnp.ones((ED,), jnp.float32),
        "bn1_b": jnp.zeros((ED,), jnp.float32),
        # outer BatchNorm2d default init
        "bn_w": jnp.ones((ED,), jnp.float32),
        "bn_b": jnp.zeros((ED,), jnp.float32),
    }

    fwd = jax.jit(repvggdw_forward)
    out = jax.block_until_ready(fwd(x, params))
    ref = repvggdw_reference(x, params)
    assert out.shape == (N, ED, H, W)
    assert jnp.allclose(out, ref, atol=2e-4, rtol=2e-4), "mismatch vs JAX reference"
    print("KERNEL_OK")
</pallas_src>

<mosaic_0001>
module attributes {stable_mosaic.version = 11 : i64} {
  func.func @kernel(%arg0: i32, %arg1: i32, %arg2: memref<2x4x256xf32, #tpu.memory_space<vmem>>, %arg3: memref<9x4x1xf32, #tpu.memory_space<vmem>>, %arg4: memref<9x256xf32, #tpu.memory_space<vmem>>, %arg5: memref<1x4x8xf32, #tpu.memory_space<vmem>>, %arg6: memref<9x4x256xf32, #tpu.memory_space<vmem>>) attributes {dimension_semantics = [#tpu.dimension_semantics<parallel>, #tpu.dimension_semantics<arbitrary>], iteration_bounds = array<i64: 1, 1>, scalar_prefetch = 0 : i64, scratch_operands = 1 : i64, tpu.core_type = #tpu.core_type<tc>, window_params = [{transform_indices = @transform_0, window_bounds = array<i64: 2, 4, 256>}, {transform_indices = @transform_1, window_bounds = array<i64: 9, 4, 1>}, {pipeline_mode = #tpu.pipeline_mode<synchronous>, transform_indices = @transform_2, window_bounds = array<i64: 9, 256>}, {transform_indices = @transform_3, window_bounds = array<i64: 1, 4, 8>}]} {
    %c0_i32 = arith.constant 0 : i32
    %0 = arith.cmpi eq, %arg1, %c0_i32 : i32
    %1 = arith.extui %0 : i1 to i32
    %c0_i32_0 = arith.constant 0 : i32
    %2 = arith.cmpi ne, %1, %c0_i32_0 : i32
    scf.if %2 {
      %c0_50 = arith.constant 0 : index
      %c0_51 = arith.constant 0 : index
      %c0_52 = arith.constant 0 : index
      %91 = vector.load %arg3[%c0_50, %c0_51, %c0_52] : memref<9x4x1xf32, #tpu.memory_space<vmem>>, vector<1x4x1xf32>
      %92 = vector.shape_cast %91 : vector<1x4x1xf32> to vector<4x1xf32>
      %c0_53 = arith.constant 0 : index
      %c0_54 = arith.constant 0 : index
      %93 = vector.load %arg4[%c0_53, %c0_54] : memref<9x256xf32, #tpu.memory_space<vmem>>, vector<1x256xf32>
      %94 = vector.broadcast %92 : vector<4x1xf32> to vector<4x256xf32>
      %95 = vector.broadcast %93 : vector<1x256xf32> to vector<4x256xf32>
      %96 = arith.mulf %94, %95 : vector<4x256xf32>
      %c0_55 = arith.constant 0 : index
      %c0_56 = arith.constant 0 : index
      %c0_57 = arith.constant 0 : index
      %97 = vector.load %arg6[%c0_55, %c0_56, %c0_57] : memref<9x4x256xf32, #tpu.memory_space<vmem>>, vector<1x4x256xf32>
      %98 = vector.shape_cast %97 : vector<1x4x256xf32> to vector<4x256xf32>
      %99 = vector.shape_cast %96 : vector<4x256xf32> to vector<1x4x256xf32>
      tpu.vector_store %arg6[%c0_55, %c0_56, %c0_57], %99 {strides = array<i32>} : memref<9x4x256xf32, #tpu.memory_space<vmem>>, vector<1x4x256xf32>,
      %c1_58 = arith.constant 1 : index
      %c0_59 = arith.constant 0 : index
      %c0_60 = arith.constant 0 : index
      %100 = vector.load %arg3[%c1_58, %c0_59, %c0_60] : memref<9x4x1xf32, #tpu.memory_space<vmem>>, vector<1x4x1xf32>
      %101 = vector.shape_cast %100 : vector<1x4x1xf32> to vector<4x1xf32>
      %c1_61 = arith.constant 1 : index
      %c0_62 = arith.constant 0 : index
      %102 = vector.load %arg4[%c1_61, %c0_62] : memref<9x256xf32, #tpu.memory_space<vmem>>, vector<1x256xf32>
      %103 = vector.broadcast %101 : vector<4x1xf32> to vector<4x256xf32>
      %104 = vector.broadcast %102 : vector<1x256xf32> to vector<4x256xf32>
      %105 = arith.mulf %103, %104 : vector<4x256xf32>
      %c1_63 = arith.constant 1 : index
      %c0_64 = arith.constant 0 : index
      %c0_65 = arith.constant 0 : index
      %106 = vector.load %arg6[%c1_63, %c0_64, %c0_65] : memref<9x4x256xf32, #tpu.memory_space<vmem>>, vector<1x4x256xf32>
      %107 = vector.shape_cast %106 : vector<1x4x256xf32> to vector<4x256xf32>
      %108 = vector.shape_cast %105 : vector<4x256xf32> to vector<1x4x256xf32>
      tpu.vector_store %arg6[%c1_63, %c0_64, %c0_65], %108 {strides = array<i32>} : memref<9x4x256xf32, #tpu.memory_space<vmem>>, vector<1x4x256xf32>,
      %c2_66 = arith.constant 2 : index
      %c0_67 = arith.constant 0 : index
      %c0_68 = arith.constant 0 : index
      %109 = vector.load %arg3[%c2_66, %c0_67, %c0_68] : memref<9x4x1xf32, #tpu.memory_space<vmem>>, vector<1x4x1xf32>
      %110 = vector.shape_cast %109 : vector<1x4x1xf32> to vector<4x1xf32>
      %c2_69 = arith.constant 2 : index
      %c0_70 = arith.constant 0 : index
      %111 = vector.load %arg4[%c2_69, %c0_70] : memref<9x256xf32, #tpu.memory_space<vmem>>, vector<1x256xf32>
      %112 = vector.broadcast %110 : vector<4x1xf32> to vector<4x256xf32>
      %113 = vector.broadcast %111 : vector<1x256xf32> to vector<4x256xf32>
      %114 = arith.mulf %112, %113 : vector<4x256xf32>
      %c2_71 = arith.constant 2 : index
      %c0_72 = arith.constant 0 : index
      %c0_73 = arith.constant 0 : index
      %115 = vector.load %arg6[%c2_71, %c0_72, %c0_73] : memref<9x4x256xf32, #tpu.memory_space<vmem>>, vector<1x4x256xf32>
      %116 = vector.shape_cast %115 : vector<1x4x256xf32> to vector<4x256xf32>
      %117 = vector.shape_cast %114 : vector<4x256xf32> to vector<1x4x256xf32>
      tpu.vector_store %arg6[%c2_71, %c0_72, %c0_73], %117 {strides = array<i32>} : memref<9x4x256xf32, #tpu.memory_space<vmem>>, vector<1x4x256xf32>,
      %c3_74 = arith.constant 3 : index
      %c0_75 = arith.constant 0 : index
      %c0_76 = arith.constant 0 : index
      %118 = vector.load %arg3[%c3_74, %c0_75, %c0_76] : memref<9x4x1xf32, #tpu.memory_space<vmem>>, vector<1x4x1xf32>
      %119 = vector.shape_cast %118 : vector<1x4x1xf32> to vector<4x1xf32>
      %c3_77 = arith.constant 3 : index
      %c0_78 = arith.constant 0 : index
      %120 = vector.load %arg4[%c3_77, %c0_78] : memref<9x256xf32, #tpu.memory_space<vmem>>, vector<1x256xf32>
      %121 = vector.broadcast %119 : vector<4x1xf32> to vector<4x256xf32>
      %122 = vector.broadcast %120 : vector<1x256xf32> to vector<4x256xf32>
      %123 = arith.mulf %121, %122 : vector<4x256xf32>
      %c3_79 = arith.constant 3 : index
      %c0_80 = arith.constant 0 : index
      %c0_81 = arith.constant 0 : index
      %124 = vector.load %arg6[%c3_79, %c0_80, %c0_81] : memref<9x4x256xf32, #tpu.memory_space<vmem>>, vector<1x4x256xf32>
      %125 = vector.shape_cast %124 : vector<1x4x256xf32> to vector<4x256xf32>
      %126 = vector.shape_cast %123 : vector<4x256xf32> to vector<1x4x256xf32>
      tpu.vector_store %arg6[%c3_79, %c0_80, %c0_81], %126 {strides = array<i32>} : memref<9x4x256xf32, #tpu.memory_space<vmem>>, vector<1x4x256xf32>,
      %c4_82 = arith.constant 4 : index
      %c0_83 = arith.constant 0 : index
      %c0_84 = arith.constant 0 : index
      %127 = vector.load %arg3[%c4_82, %c0_83, %c0_84] : memref<9x4x1xf32, #tpu.memory_space<vmem>>, vector<1x4x1xf32>
      %128 = vector.shape_cast %127 : vector<1x4x1xf32> to vector<4x1xf32>
      %c4_85 = arith.constant 4 : index
      %c0_86 = arith.constant 0 : index
      %129 = vector.load %arg4[%c4_85, %c0_86] : memref<9x256xf32, #tpu.memory_space<vmem>>, vector<1x256xf32>
      %130 = vector.broadcast %128 : vector<4x1xf32> to vector<4x256xf32>
      %131 = vector.broadcast %129 : vector<1x256xf32> to vector<4x256xf32>
      %132 = arith.mulf %130, %131 : vector<4x256xf32>
      %c4_87 = arith.constant 4 : index
      %c0_88 = arith.constant 0 : index
      %c0_89 = arith.constant 0 : index
      %133 = vector.load %arg6[%c4_87, %c0_88, %c0_89] : memref<9x4x256xf32, #tpu.memory_space<vmem>>, vector<1x4x256xf32>
      %134 = vector.shape_cast %133 : vector<1x4x256xf32> to vector<4x256xf32>
      %135 = vector.shape_cast %132 : vector<4x256xf32> to vector<1x4x256xf32>
      tpu.vector_store %arg6[%c4_87, %c0_88, %c0_89], %135 {strides = array<i32>} : memref<9x4x256xf32, #tpu.memory_space<vmem>>, vector<1x4x256xf32>,
      %c5_90 = arith.constant 5 : index
      %c0_91 = arith.constant 0 : index
      %c0_92 = arith.constant 0 : index
      %136 = vector.load %arg3[%c5_90, %c0_91, %c0_92] : memref<9x4x1xf32, #tpu.memory_space<vmem>>, vector<1x4x1xf32>
      %137 = vector.shape_cast %136 : vector<1x4x1xf32> to vector<4x1xf32>
      %c5_93 = arith.constant 5 : index
      %c0_94 = arith.constant 0 : index
      %138 = vector.load %arg4[%c5_93, %c0_94] : memref<9x256xf32, #tpu.memory_space<vmem>>, vector<1x256xf32>
      %139 = vector.broadcast %137 : vector<4x1xf32> to vector<4x256xf32>
      %140 = vector.broadcast %138 : vector<1x256xf32> to vector<4x256xf32>
      %141 = arith.mulf %139, %140 : vector<4x256xf32>
      %c5_95 = arith.constant 5 : index
      %c0_96 = arith.constant 0 : index
      %c0_97 = arith.constant 0 : index
      %142 = vector.load %arg6[%c5_95, %c0_96, %c0_97] : memref<9x4x256xf32, #tpu.memory_space<vmem>>, vector<1x4x256xf32>
      %143 = vector.shape_cast %142 : vector<1x4x256xf32> to vector<4x256xf32>
      %144 = vector.shape_cast %141 : vector<4x256xf32> to vector<1x4x256xf32>
      tpu.vector_store %arg6[%c5_95, %c0_96, %c0_97], %144 {strides = array<i32>} : memref<9x4x256xf32, #tpu.memory_space<vmem>>, vector<1x4x256xf32>,
      %c6_98 = arith.constant 6 : index
      %c0_99 = arith.constant 0 : index
      %c0_100 = arith.constant 0 : index
      %145 = vector.load %arg3[%c6_98, %c0_99, %c0_100] : memref<9x4x1xf32, #tpu.memory_space<vmem>>, vector<1x4x1xf32>
      %146 = vector.shape_cast %145 : vector<1x4x1xf32> to vector<4x1xf32>
      %c6_101 = arith.constant 6 : index
      %c0_102 = arith.constant 0 : index
      %147 = vector.load %arg4[%c6_101, %c0_102] : memref<9x256xf32, #tpu.memory_space<vmem>>, vector<1x256xf32>
      %148 = vector.broadcast %146 : vector<4x1xf32> to vector<4x256xf32>
      %149 = vector.broadcast %147 : vector<1x256xf32> to vector<4x256xf32>
      %150 = arith.mulf %148, %149 : vector<4x256xf32>
      %c6_103 = arith.constant 6 : index
      %c0_104 = arith.constant 0 : index
      %c0_105 = arith.constant 0 : index
      %151 = vector.load %arg6[%c6_103, %c0_104, %c0_105] : memref<9x4x256xf32, #tpu.memory_space<vmem>>, vector<1x4x256xf32>
      %152 = vector.shape_cast %151 : vector<1x4x256xf32> to vector<4x256xf32>
      %153 = vector.shape_cast %150 : vector<4x256xf32> to vector<1x4x256xf32>
      tpu.vector_store %arg6[%c6_103, %c0_104, %c0_105], %153 {strides = array<i32>} : memref<9x4x256xf32, #tpu.memory_space<vmem>>, vector<1x4x256xf32>,
      %c7_106 = arith.constant 7 : index
      %c0_107 = arith.constant 0 : index
      %c0_108 = arith.constant 0 : index
      %154 = vector.load %arg3[%c7_106, %c0_107, %c0_108] : memref<9x4x1xf32, #tpu.memory_space<vmem>>, vector<1x4x1xf32>
      %155 = vector.shape_cast %154 : vector<1x4x1xf32> to vector<4x1xf32>
      %c7_109 = arith.constant 7 : index
      %c0_110 = arith.constant 0 : index
      %156 = vector.load %arg4[%c7_109, %c0_110] : memref<9x256xf32, #tpu.memory_space<vmem>>, vector<1x256xf32>
      %157 = vector.broadcast %155 : vector<4x1xf32> to vector<4x256xf32>
      %158 = vector.broadcast %156 : vector<1x256xf32> to vector<4x256xf32>
      %159 = arith.mulf %157, %158 : vector<4x256xf32>
      %c7_111 = arith.constant 7 : index
      %c0_112 = arith.constant 0 : index
      %c0_113 = arith.constant 0 : index
      %160 = vector.load %arg6[%c7_111, %c0_112, %c0_113] : memref<9x4x256xf32, #tpu.memory_space<vmem>>, vector<1x4x256xf32>
      %161 = vector.shape_cast %160 : vector<1x4x256xf32> to vector<4x256xf32>
      %162 = vector.shape_cast %159 : vector<4x256xf32> to vector<1x4x256xf32>
      tpu.vector_store %arg6[%c7_111, %c0_112, %c0_113], %162 {strides = array<i32>} : memref<9x4x256xf32, #tpu.memory_space<vmem>>, vector<1x4x256xf32>,
      %c8_114 = arith.constant 8 : index
      %c0_115 = arith.constant 0 : index
      %c0_116 = arith.constant 0 : index
      %163 = vector.load %arg3[%c8_114, %c0_115, %c0_116] : memref<9x4x1xf32, #tpu.memory_space<vmem>>, vector<1x4x1xf32>
      %164 = vector.shape_cast %163 : vector<1x4x1xf32> to vector<4x1xf32>
      %c8_117 = arith.constant 8 : index
      %c0_118 = arith.constant 0 : index
      %165 = vector.load %arg4[%c8_117, %c0_118] : memref<9x256xf32, #tpu.memory_space<vmem>>, vector<1x256xf32>
      %166 = vector.broadcast %164 : vector<4x1xf32> to vector<4x256xf32>
      %167 = vector.broadcast %165 : vector<1x256xf32> to vector<4x256xf32>
      %168 = arith.mulf %166, %167 : vector<4x256xf32>
      %c8_119 = arith.constant 8 : index
      %c0_120 = arith.constant 0 : index
      %c0_121 = arith.constant 0 : index
      %169 = vector.load %arg6[%c8_119, %c0_120, %c0_121] : memref<9x4x256xf32, #tpu.memory_space<vmem>>, vector<1x4x256xf32>
      %170 = vector.shape_cast %169 : vector<1x4x256xf32> to vector<4x256xf32>
      %171 = vector.shape_cast %168 : vector<4x256xf32> to vector<1x4x256xf32>
      tpu.vector_store %arg6[%c8_119, %c0_120, %c0_121], %171 {strides = array<i32>} : memref<9x4x256xf32, #tpu.memory_space<vmem>>, vector<1x4x256xf32>,
    } else {
    }
    %c0 = arith.constant 0 : index
    %c0_1 = arith.constant 0 : index
    %c0_2 = arith.constant 0 : index
    %3 = vector.load %arg2[%c0, %c0_1, %c0_2] : memref<2x4x256xf32, #tpu.memory_space<vmem>>, vector<2x4x256xf32>
    %c1_i32 = arith.constant 1 : i32
    %4 = tpu.dynamic_rotate %3 by %c1_i32 dim 2 : vector<2x4x256xf32>, i32 -> vector<2x4x256xf32>
    %c255_i32 = arith.constant 255 : i32
    %5 = tpu.dynamic_rotate %3 by %c255_i32 dim 2 : vector<2x4x256xf32>, i32 -> vector<2x4x256xf32>
    %c0_3 = arith.constant 0 : index
    %c0_4 = arith.constant 0 : index
    %c0_5 = arith.constant 0 : index
    %6 = vector.load %arg6[%c0_3, %c0_4, %c0_5] : memref<9x4x256xf32, #tpu.memory_space<vmem>>, vector<1x4x256xf32>
    %7 = vector.shape_cast %6 : vector<1x4x256xf32> to vector<4x256xf32>
    %8 = vector.shape_cast %7 : vector<4x256xf32> to vector<1x4x256xf32>
    %9 = vector.broadcast %8 : vector<1x4x256xf32> to vector<2x4x256xf32>
    %10 = arith.mulf %4, %9 : vector<2x4x256xf32>
    %c1 = arith.constant 1 : index
    %c0_6 = arith.constant 0 : index
    %c0_7 = arith.constant 0 : index
    %11 = vector.load %arg6[%c1, %c0_6, %c0_7] : memref<9x4x256xf32, #tpu.memory_space<vmem>>, vector<1x4x256xf32>
    %12 = vector.shape_cast %11 : vector<1x4x256xf32> to vector<4x256xf32>
    %13 = vector.shape_cast %12 : vector<4x256xf32> to vector<1x4x256xf32>
    %14 = vector.broadcast %13 : vector<1x4x256xf32> to vector<2x4x256xf32>
    %15 = arith.mulf %3, %14 : vector<2x4x256xf32>
    %16 = arith.addf %10, %15 : vector<2x4x256xf32>
    %c2 = arith.constant 2 : index
    %c0_8 = arith.constant 0 : index
    %c0_9 = arith.constant 0 : index
    %17 = vector.load %arg6[%c2, %c0_8, %c0_9] : memref<9x4x256xf32, #tpu.memory_space<vmem>>, vector<1x4x256xf32>
    %18 = vector.shape_cast %17 : vector<1x4x256xf32> to vector<4x256xf32>
    %19 = vector.shape_cast %18 : vector<4x256xf32> to vector<1x4x256xf32>
    %20 = vector.broadcast %19 : vector<1x4x256xf32> to vector<2x4x256xf32>
    %21 = arith.mulf %5, %20 : vector<2x4x256xf32>
    %22 = arith.addf %16, %21 : vector<2x4x256xf32>
    %c3 = arith.constant 3 : index
    %c0_10 = arith.constant 0 : index
    %c0_11 = arith.constant 0 : index
    %23 = vector.load %arg6[%c3, %c0_10, %c0_11] : memref<9x4x256xf32, #tpu.memory_space<vmem>>, vector<1x4x256xf32>
    %24 = vector.shape_cast %23 : vector<1x4x256xf32> to vector<4x256xf32>
    %25 = vector.shape_cast %24 : vector<4x256xf32> to vector<1x4x256xf32>
    %26 = vector.broadcast %25 : vector<1x4x256xf32> to vector<2x4x256xf32>
    %27 = arith.mulf %4, %26 : vector<2x4x256xf32>
    %c4 = arith.constant 4 : index
    %c0_12 = arith.constant 0 : index
    %c0_13 = arith.constant 0 : index
    %28 = vector.load %arg6[%c4, %c0_12, %c0_13] : memref<9x4x256xf32, #tpu.memory_space<vmem>>, vector<1x4x256xf32>
    %29 = vector.shape_cast %28 : vector<1x4x256xf32> to vector<4x256xf32>
    %30 = vector.shape_cast %29 : vector<4x256xf32> to vector<1x4x256xf32>
    %31 = vector.broadcast %30 : vector<1x4x256xf32> to vector<2x4x256xf32>
    %32 = arith.mulf %3, %31 : vector<2x4x256xf32>
    %33 = arith.addf %27, %32 : vector<2x4x256xf32>
    %c5 = arith.constant 5 : index
    %c0_14 = arith.constant 0 : index
    %c0_15 = arith.constant 0 : index
    %34 = vector.load %arg6[%c5, %c0_14, %c0_15] : memref<9x4x256xf32, #tpu.memory_space<vmem>>, vector<1x4x256xf32>
    %35 = vector.shape_cast %34 : vector<1x4x256xf32> to vector<4x256xf32>
    %36 = vector.shape_cast %35 : vector<4x256xf32> to vector<1x4x256xf32>
    %37 = vector.broadcast %36 : vector<1x4x256xf32> to vector<2x4x256xf32>
    %38 = arith.mulf %5, %37 : vector<2x4x256xf32>
    %39 = arith.addf %33, %38 : vector<2x4x256xf32>
    %c6 = arith.constant 6 : index
    %c0_16 = arith.constant 0 : index
    %c0_17 = arith.constant 0 : index
    %40 = vector.load %arg6[%c6, %c0_16, %c0_17] : memref<9x4x256xf32, #tpu.memory_space<vmem>>, vector<1x4x256xf32>
    %41 = vector.shape_cast %40 : vector<1x4x256xf32> to vector<4x256xf32>
    %42 = vector.shape_cast %41 : vector<4x256xf32> to vector<1x4x256xf32>
    %43 = vector.broadcast %42 : vector<1x4x256xf32> to vector<2x4x256xf32>
    %44 = arith.mulf %4, %43 : vector<2x4x256xf32>
    %c7 = arith.constant 7 : index
    %c0_18 = arith.constant 0 : index
    %c0_19 = arith.constant 0 : index
    %45 = vector.load %arg6[%c7, %c0_18, %c0_19] : memref<9x4x256xf32, #tpu.memory_space<vmem>>, vector<1x4x256xf32>
    %46 = vector.shape_cast %45 : vector<1x4x256xf32> to vector<4x256xf32>
    %47 = vector.shape_cast %46 : vector<4x256xf32> to vector<1x4x256xf32>
    %48 = vector.broadcast %47 : vector<1x4x256xf32> to vector<2x4x256xf32>
    %49 = arith.mulf %3, %48 : vector<2x4x256xf32>
    %50 = arith.addf %44, %49 : vector<2x4x256xf32>
    %c8 = arith.constant 8 : index
    %c0_20 = arith.constant 0 : index
    %c0_21 = arith.constant 0 : index
    %51 = vector.load %arg6[%c8, %c0_20, %c0_21] : memref<9x4x256xf32, #tpu.memory_space<vmem>>, vector<1x4x256xf32>
    %52 = vector.shape_cast %51 : vector<1x4x256xf32> to vector<4x256xf32>
    %53 = vector.shape_cast %52 : vector<4x256xf32> to vector<1x4x256xf32>
    %54 = vector.broadcast %53 : vector<1x4x256xf32> to vector<2x4x256xf32>
    %55 = arith.mulf %5, %54 : vector<2x4x256xf32>
    %56 = arith.addf %50, %55 : vector<2x4x256xf32>
    %c16_i32 = arith.constant 16 : i32
    %57 = tpu.dynamic_rotate %22 by %c16_i32 dim 2 : vector<2x4x256xf32>, i32 -> vector<2x4x256xf32>
    %58 = arith.addf %39, %57 : vector<2x4x256xf32>
    %c240_i32 = arith.constant 240 : i32
    %59 = tpu.dynamic_rotate %56 by %c240_i32 dim 2 : vector<2x4x256xf32>, i32 -> vector<2x4x256xf32>
    %60 = arith.addf %58, %59 : vector<2x4x256xf32>
    %cst = arith.constant dense<0.000000e+00> : vector<4x256xf32>
    %61 = vector.multi_reduction <add>, %60, %cst [0] : vector<2x4x256xf32> to vector<4x256xf32>
    %cst_22 = arith.constant dense<0.000000e+00> : vector<4xf32>
    %62 = vector.multi_reduction <add>, %61, %cst_22 [1] : vector<4x256xf32> to vector<4xf32>
    %63 = vector.shape_cast %62 : vector<4xf32> to vector<4x1xf32>
    %64 = vector.shape_cast %63 : vector<4x1xf32> to vector<1x4x1xf32>
    %c0_23 = arith.constant 0 : index
    %c0_24 = arith.constant 0 : index
    %c0_25 = arith.constant 0 : index
    %65 = vector.load %arg5[%c0_23, %c0_24, %c0_25] : memref<1x4x8xf32, #tpu.memory_space<vmem>>, vector<1x4x1xf32>
    tpu.vector_store %arg5[%c0_23, %c0_24, %c0_25], %64 {strides = array<i32>} : memref<1x4x8xf32, #tpu.memory_space<vmem>>, vector<1x4x1xf32>,
    %66 = arith.mulf %60, %60 : vector<2x4x256xf32>
    %cst_26 = arith.constant dense<0.000000e+00> : vector<4x256xf32>
    %67 = vector.multi_reduction <add>, %66, %cst_26 [0] : vector<2x4x256xf32> to vector<4x256xf32>
    %cst_27 = arith.constant dense<0.000000e+00> : vector<4xf32>
    %68 = vector.multi_reduction <add>, %67, %cst_27 [1] : vector<4x256xf32> to vector<4xf32>
    %69 = vector.shape_cast %68 : vector<4xf32> to vector<4x1xf32>
    %70 = vector.shape_cast %69 : vector<4x1xf32> to vector<1x4x1xf32>
    %c0_28 = arith.constant 0 : index
    %c0_29 = arith.constant 0 : index
    %c1_30 = arith.constant 1 : index
    %71 = vector.load %arg5[%c0_28, %c0_29, %c1_30] : memref<1x4x8xf32, #tpu.memory_space<vmem>>, vector<1x4x1xf32>
    tpu.vector_store %arg5[%c0_28, %c0_29, %c1_30], %70 {strides = array<i32>} : memref<1x4x8xf32, #tpu.memory_space<vmem>>, vector<1x4x1xf32>,
    %cst_31 = arith.constant dense<0.000000e+00> : vector<4x256xf32>
    %72 = vector.multi_reduction <add>, %3, %cst_31 [0] : vector<2x4x256xf32> to vector<4x256xf32>
    %cst_32 = arith.constant dense<0.000000e+00> : vector<4xf32>
    %73 = vector.multi_reduction <add>, %72, %cst_32 [1] : vector<4x256xf32> to vector<4xf32>
    %74 = vector.shape_cast %73 : vector<4xf32> to vector<4x1xf32>
    %75 = vector.shape_cast %74 : vector<4x1xf32> to vector<1x4x1xf32>
    %c0_33 = arith.constant 0 : index
    %c0_34 = arith.constant 0 : index
    %c2_35 = arith.constant 2 : index
    %76 = vector.load %arg5[%c0_33, %c0_34, %c2_35] : memref<1x4x8xf32, #tpu.memory_space<vmem>>, vector<1x4x1xf32>
    tpu.vector_store %arg5[%c0_33, %c0_34, %c2_35], %75 {strides = array<i32>} : memref<1x4x8xf32, #tpu.memory_space<vmem>>, vector<1x4x1xf32>,
    %77 = arith.mulf %3, %3 : vector<2x4x256xf32>
    %cst_36 = arith.constant dense<0.000000e+00> : vector<4x256xf32>
    %78 = vector.multi_reduction <add>, %77, %cst_36 [0] : vector<2x4x256xf32> to vector<4x256xf32>
    %cst_37 = arith.constant dense<0.000000e+00> : vector<4xf32>
    %79 = vector.multi_reduction <add>, %78, %cst_37 [1] : vector<4x256xf32> to vector<4xf32>
    %80 = vector.shape_cast %79 : vector<4xf32> to vector<4x1xf32>
    %81 = vector.shape_cast %80 : vector<4x1xf32> to vector<1x4x1xf32>
    %c0_38 = arith.constant 0 : index
    %c0_39 = arith.constant 0 : index
    %c3_40 = arith.constant 3 : index
    %82 = vector.load %arg5[%c0_38, %c0_39, %c3_40] : memref<1x4x8xf32, #tpu.memory_space<vmem>>, vector<1x4x1xf32>
    tpu.vector_store %arg5[%c0_38, %c0_39, %c3_40], %81 {strides = array<i32>} : memref<1x4x8xf32, #tpu.memory_space<vmem>>, vector<1x4x1xf32>,
    %83 = arith.mulf %60, %3 : vector<2x4x256xf32>
    %cst_41 = arith.constant dense<0.000000e+00> : vector<4x256xf32>
    %84 = vector.multi_reduction <add>, %83, %cst_41 [0] : vector<2x4x256xf32> to vector<4x256xf32>
    %cst_42 = arith.constant dense<0.000000e+00> : vector<4xf32>
    %85 = vector.multi_reduction <add>, %84, %cst_42 [1] : vector<4x256xf32> to vector<4xf32>
    %86 = vector.shape_cast %85 : vector<4xf32> to vector<4x1xf32>
    %87 = vector.shape_cast %86 : vector<4x1xf32> to vector<1x4x1xf32>
    %c0_43 = arith.constant 0 : index
    %c0_44 = arith.constant 0 : index
    %c4_45 = arith.constant 4 : index
    %88 = vector.load %arg5[%c0_43, %c0_44, %c4_45] : memref<1x4x8xf32, #tpu.memory_space<vmem>>, vector<1x4x1xf32>
    tpu.vector_store %arg5[%c0_43, %c0_44, %c4_45], %87 {strides = array<i32>} : memref<1x4x8xf32, #tpu.memory_space<vmem>>, vector<1x4x1xf32>,
    %cst_46 = arith.constant 0.000000e+00 : f32
    %89 = vector.broadcast %cst_46 : f32 to vector<1x4x3xf32>
    %c0_47 = arith.constant 0 : index
    %c0_48 = arith.constant 0 : index
    %c5_49 = arith.constant 5 : index
    %90 = vector.load %arg5[%c0_47, %c0_48, %c5_49] : memref<1x4x8xf32, #tpu.memory_space<vmem>>, vector<1x4x3xf32>
    tpu.vector_store %arg5[%c0_47, %c0_48, %c5_49], %89 {strides = array<i32>} : memref<1x4x8xf32, #tpu.memory_space<vmem>>, vector<1x4x3xf32>,
    return
  }
  func.func @transform_0(%arg0: i32, %arg1: i32) -> (i32, i32, i32) {
    %c0_i32 = arith.constant 0 : i32
    %c0_i32_0 = arith.constant 0 : i32
    return %arg1, %arg0, %c0_i32 : i32, i32, i32
  }
  func.func @transform_1(%arg0: i32, %arg1: i32) -> (i32, i32, i32) {
    %c0_i32 = arith.constant 0 : i32
    %c0_i32_0 = arith.constant 0 : i32
    %c0_i32_1 = arith.constant 0 : i32
    return %c0_i32, %arg0, %c0_i32_0 : i32, i32, i32
  }
  func.func @transform_2(%arg0: i32, %arg1: i32) -> (i32, i32) {
    %c0_i32 = arith.constant 0 : i32
    %c0_i32_0 = arith.constant 0 : i32
    %c0_i32_1 = arith.constant 0 : i32
    return %c0_i32, %c0_i32_0 : i32, i32
  }
  func.func @transform_3(%arg0: i32, %arg1: i32) -> (i32, i32, i32) {
    %c0_i32 = arith.constant 0 : i32
    %c0_i32_0 = arith.constant 0 : i32
    return %arg1, %arg0, %c0_i32 : i32, i32, i32
  }
}

module attributes {stable_mosaic.version = 11 : i64} {
  func.func @kernel(%arg0: i32, %arg1: i32, %arg2: memref<2x4x256xf32, #tpu.memory_space<vmem>>, %arg3: memref<9x4x1xf32, #tpu.memory_space<vmem>>, %arg4: memref<9x256xf32, #tpu.memory_space<vmem>>, %arg5: memref<4x1xf32, #tpu.memory_space<vmem>>, %arg6: memref<2x4x256xf32, #tpu.memory_space<vmem>>, %arg7: memref<9x4x256xf32, #tpu.memory_space<vmem>>) attributes {dimension_semantics = [#tpu.dimension_semantics<parallel>, #tpu.dimension_semantics<arbitrary>], iteration_bounds = array<i64: 1, 1>, scalar_prefetch = 0 : i64, scratch_operands = 1 : i64, tpu.core_type = #tpu.core_type<tc>, window_params = [{transform_indices = @transform_0, window_bounds = array<i64: 2, 4, 256>}, {transform_indices = @transform_1, window_bounds = array<i64: 9, 4, 1>}, {pipeline_mode = #tpu.pipeline_mode<synchronous>, transform_indices = @transform_2, window_bounds = array<i64: 9, 256>}, {transform_indices = @transform_3, window_bounds = array<i64: 4, 1>}, {transform_indices = @transform_4, window_bounds = array<i64: 2, 4, 256>}]} {
    %c0_i32 = arith.constant 0 : i32
    %0 = arith.cmpi eq, %arg1, %c0_i32 : i32
    %1 = arith.extui %0 : i1 to i32
    %c0_i32_0 = arith.constant 0 : i32
    %2 = arith.cmpi ne, %1, %c0_i32_0 : i32
    scf.if %2 {
      %c0_27 = arith.constant 0 : index
      %c0_28 = arith.constant 0 : index
      %c0_29 = arith.constant 0 : index
      %66 = vector.load %arg3[%c0_27, %c0_28, %c0_29] : memref<9x4x1xf32, #tpu.memory_space<vmem>>, vector<1x4x1xf32>
      %67 = vector.shape_cast %66 : vector<1x4x1xf32> to vector<4x1xf32>
      %c0_30 = arith.constant 0 : index
      %c0_31 = arith.constant 0 : index
      %68 = vector.load %arg4[%c0_30, %c0_31] : memref<9x256xf32, #tpu.memory_space<vmem>>, vector<1x256xf32>
      %69 = vector.broadcast %67 : vector<4x1xf32> to vector<4x256xf32>
      %70 = vector.broadcast %68 : vector<1x256xf32> to vector<4x256xf32>
      %71 = arith.mulf %69, %70 : vector<4x256xf32>
      %c0_32 = arith.constant 0 : index
      %c0_33 = arith.constant 0 : index
      %c0_34 = arith.constant 0 : index
      %72 = vector.load %arg7[%c0_32, %c0_33, %c0_34] : memref<9x4x256xf32, #tpu.memory_space<vmem>>, vector<1x4x256xf32>
      %73 = vector.shape_cast %72 : vector<1x4x256xf32> to vector<4x256xf32>
      %74 = vector.shape_cast %71 : vector<4x256xf32> to vector<1x4x256xf32>
      tpu.vector_store %arg7[%c0_32, %c0_33, %c0_34], %74 {strides = array<i32>} : memref<9x4x256xf32, #tpu.memory_space<vmem>>, vector<1x4x256xf32>,
      %c1_35 = arith.constant 1 : index
      %c0_36 = arith.constant 0 : index
      %c0_37 = arith.constant 0 : index
      %75 = vector.load %arg3[%c1_35, %c0_36, %c0_37] : memref<9x4x1xf32, #tpu.memory_space<vmem>>, vector<1x4x1xf32>
      %76 = vector.shape_cast %75 : vector<1x4x1xf32> to vector<4x1xf32>
      %c1_38 = arith.constant 1 : index
      %c0_39 = arith.constant 0 : index
      %77 = vector.load %arg4[%c1_38, %c0_39] : memref<9x256xf32, #tpu.memory_space<vmem>>, vector<1x256xf32>
      %78 = vector.broadcast %76 : vector<4x1xf32> to vector<4x256xf32>
      %79 = vector.broadcast %77 : vector<1x256xf32> to vector<4x256xf32>
      %80 = arith.mulf %78, %79 : vector<4x256xf32>
      %c1_40 = arith.constant 1 : index
      %c0_41 = arith.constant 0 : index
      %c0_42 = arith.constant 0 : index
      %81 = vector.load %arg7[%c1_40, %c0_41, %c0_42] : memref<9x4x256xf32, #tpu.memory_space<vmem>>, vector<1x4x256xf32>
      %82 = vector.shape_cast %81 : vector<1x4x256xf32> to vector<4x256xf32>
      %83 = vector.shape_cast %80 : vector<4x256xf32> to vector<1x4x256xf32>
      tpu.vector_store %arg7[%c1_40, %c0_41, %c0_42], %83 {strides = array<i32>} : memref<9x4x256xf32, #tpu.memory_space<vmem>>, vector<1x4x256xf32>,
      %c2_43 = arith.constant 2 : index
      %c0_44 = arith.constant 0 : index
      %c0_45 = arith.constant 0 : index
      %84 = vector.load %arg3[%c2_43, %c0_44, %c0_45] : memref<9x4x1xf32, #tpu.memory_space<vmem>>, vector<1x4x1xf32>
      %85 = vector.shape_cast %84 : vector<1x4x1xf32> to vector<4x1xf32>
      %c2_46 = arith.constant 2 : index
      %c0_47 = arith.constant 0 : index
      %86 = vector.load %arg4[%c2_46, %c0_47] : memref<9x256xf32, #tpu.memory_space<vmem>>, vector<1x256xf32>
      %87 = vector.broadcast %85 : vector<4x1xf32> to vector<4x256xf32>
      %88 = vector.broadcast %86 : vector<1x256xf32> to vector<4x256xf32>
      %89 = arith.mulf %87, %88 : vector<4x256xf32>
      %c2_48 = arith.constant 2 : index
      %c0_49 = arith.constant 0 : index
      %c0_50 = arith.constant 0 : index
      %90 = vector.load %arg7[%c2_48, %c0_49, %c0_50] : memref<9x4x256xf32, #tpu.memory_space<vmem>>, vector<1x4x256xf32>
      %91 = vector.shape_cast %90 : vector<1x4x256xf32> to vector<4x256xf32>
      %92 = vector.shape_cast %89 : vector<4x256xf32> to vector<1x4x256xf32>
      tpu.vector_store %arg7[%c2_48, %c0_49, %c0_50], %92 {strides = array<i32>} : memref<9x4x256xf32, #tpu.memory_space<vmem>>, vector<1x4x256xf32>,
      %c3_51 = arith.constant 3 : index
      %c0_52 = arith.constant 0 : index
      %c0_53 = arith.constant 0 : index
      %93 = vector.load %arg3[%c3_51, %c0_52, %c0_53] : memref<9x4x1xf32, #tpu.memory_space<vmem>>, vector<1x4x1xf32>
      %94 = vector.shape_cast %93 : vector<1x4x1xf32> to vector<4x1xf32>
      %c3_54 = arith.constant 3 : index
      %c0_55 = arith.constant 0 : index
      %95 = vector.load %arg4[%c3_54, %c0_55] : memref<9x256xf32, #tpu.memory_space<vmem>>, vector<1x256xf32>
      %96 = vector.broadcast %94 : vector<4x1xf32> to vector<4x256xf32>
      %97 = vector.broadcast %95 : vector<1x256xf32> to vector<4x256xf32>
      %98 = arith.mulf %96, %97 : vector<4x256xf32>
      %c3_56 = arith.constant 3 : index
      %c0_57 = arith.constant 0 : index
      %c0_58 = arith.constant 0 : index
      %99 = vector.load %arg7[%c3_56, %c0_57, %c0_58] : memref<9x4x256xf32, #tpu.memory_space<vmem>>, vector<1x4x256xf32>
      %100 = vector.shape_cast %99 : vector<1x4x256xf32> to vector<4x256xf32>
      %101 = vector.shape_cast %98 : vector<4x256xf32> to vector<1x4x256xf32>
      tpu.vector_store %arg7[%c3_56, %c0_57, %c0_58], %101 {strides = array<i32>} : memref<9x4x256xf32, #tpu.memory_space<vmem>>, vector<1x4x256xf32>,
      %c4_59 = arith.constant 4 : index
      %c0_60 = arith.constant 0 : index
      %c0_61 = arith.constant 0 : index
      %102 = vector.load %arg3[%c4_59, %c0_60, %c0_61] : memref<9x4x1xf32, #tpu.memory_space<vmem>>, vector<1x4x1xf32>
      %103 = vector.shape_cast %102 : vector<1x4x1xf32> to vector<4x1xf32>
      %c4_62 = arith.constant 4 : index
      %c0_63 = arith.constant 0 : index
      %104 = vector.load %arg4[%c4_62, %c0_63] : memref<9x256xf32, #tpu.memory_space<vmem>>, vector<1x256xf32>
      %105 = vector.broadcast %103 : vector<4x1xf32> to vector<4x256xf32>
      %106 = vector.broadcast %104 : vector<1x256xf32> to vector<4x256xf32>
      %107 = arith.mulf %105, %106 : vector<4x256xf32>
      %c4_64 = arith.constant 4 : index
      %c0_65 = arith.constant 0 : index
      %c0_66 = arith.constant 0 : index
      %108 = vector.load %arg7[%c4_64, %c0_65, %c0_66] : memref<9x4x256xf32, #tpu.memory_space<vmem>>, vector<1x4x256xf32>
      %109 = vector.shape_cast %108 : vector<1x4x256xf32> to vector<4x256xf32>
      %110 = vector.shape_cast %107 : vector<4x256xf32> to vector<1x4x256xf32>
      tpu.vector_store %arg7[%c4_64, %c0_65, %c0_66], %110 {strides = array<i32>} : memref<9x4x256xf32, #tpu.memory_space<vmem>>, vector<1x4x256xf32>,
      %c5_67 = arith.constant 5 : index
      %c0_68 = arith.constant 0 : index
      %c0_69 = arith.constant 0 : index
      %111 = vector.load %arg3[%c5_67, %c0_68, %c0_69] : memref<9x4x1xf32, #tpu.memory_space<vmem>>, vector<1x4x1xf32>
      %112 = vector.shape_cast %111 : vector<1x4x1xf32> to vector<4x1xf32>
      %c5_70 = arith.constant 5 : index
      %c0_71 = arith.constant 0 : index
      %113 = vector.load %arg4[%c5_70, %c0_71] : memref<9x256xf32, #tpu.memory_space<vmem>>, vector<1x256xf32>
      %114 = vector.broadcast %112 : vector<4x1xf32> to vector<4x256xf32>
      %115 = vector.broadcast %113 : vector<1x256xf32> to vector<4x256xf32>
      %116 = arith.mulf %114, %115 : vector<4x256xf32>
      %c5_72 = arith.constant 5 : index
      %c0_73 = arith.constant 0 : index
      %c0_74 = arith.constant 0 : index
      %117 = vector.load %arg7[%c5_72, %c0_73, %c0_74] : memref<9x4x256xf32, #tpu.memory_space<vmem>>, vector<1x4x256xf32>
      %118 = vector.shape_cast %117 : vector<1x4x256xf32> to vector<4x256xf32>
      %119 = vector.shape_cast %116 : vector<4x256xf32> to vector<1x4x256xf32>
      tpu.vector_store %arg7[%c5_72, %c0_73, %c0_74], %119 {strides = array<i32>} : memref<9x4x256xf32, #tpu.memory_space<vmem>>, vector<1x4x256xf32>,
      %c6_75 = arith.constant 6 : index
      %c0_76 = arith.constant 0 : index
      %c0_77 = arith.constant 0 : index
      %120 = vector.load %arg3[%c6_75, %c0_76, %c0_77] : memref<9x4x1xf32, #tpu.memory_space<vmem>>, vector<1x4x1xf32>
      %121 = vector.shape_cast %120 : vector<1x4x1xf32> to vector<4x1xf32>
      %c6_78 = arith.constant 6 : index
      %c0_79 = arith.constant 0 : index
      %122 = vector.load %arg4[%c6_78, %c0_79] : memref<9x256xf32, #tpu.memory_space<vmem>>, vector<1x256xf32>
      %123 = vector.broadcast %121 : vector<4x1xf32> to vector<4x256xf32>
      %124 = vector.broadcast %122 : vector<1x256xf32> to vector<4x256xf32>
      %125 = arith.mulf %123, %124 : vector<4x256xf32>
      %c6_80 = arith.constant 6 : index
      %c0_81 = arith.constant 0 : index
      %c0_82 = arith.constant 0 : index
      %126 = vector.load %arg7[%c6_80, %c0_81, %c0_82] : memref<9x4x256xf32, #tpu.memory_space<vmem>>, vector<1x4x256xf32>
      %127 = vector.shape_cast %126 : vector<1x4x256xf32> to vector<4x256xf32>
      %128 = vector.shape_cast %125 : vector<4x256xf32> to vector<1x4x256xf32>
      tpu.vector_store %arg7[%c6_80, %c0_81, %c0_82], %128 {strides = array<i32>} : memref<9x4x256xf32, #tpu.memory_space<vmem>>, vector<1x4x256xf32>,
      %c7_83 = arith.constant 7 : index
      %c0_84 = arith.constant 0 : index
      %c0_85 = arith.constant 0 : index
      %129 = vector.load %arg3[%c7_83, %c0_84, %c0_85] : memref<9x4x1xf32, #tpu.memory_space<vmem>>, vector<1x4x1xf32>
      %130 = vector.shape_cast %129 : vector<1x4x1xf32> to vector<4x1xf32>
      %c7_86 = arith.constant 7 : index
      %c0_87 = arith.constant 0 : index
      %131 = vector.load %arg4[%c7_86, %c0_87] : memref<9x256xf32, #tpu.memory_space<vmem>>, vector<1x256xf32>
      %132 = vector.broadcast %130 : vector<4x1xf32> to vector<4x256xf32>
      %133 = vector.broadcast %131 : vector<1x256xf32> to vector<4x256xf32>
      %134 = arith.mulf %132, %133 : vector<4x256xf32>
      %c7_88 = arith.constant 7 : index
      %c0_89 = arith.constant 0 : index
      %c0_90 = arith.constant 0 : index
      %135 = vector.load %arg7[%c7_88, %c0_89, %c0_90] : memref<9x4x256xf32, #tpu.memory_space<vmem>>, vector<1x4x256xf32>
      %136 = vector.shape_cast %135 : vector<1x4x256xf32> to vector<4x256xf32>
      %137 = vector.shape_cast %134 : vector<4x256xf32> to vector<1x4x256xf32>
      tpu.vector_store %arg7[%c7_88, %c0_89, %c0_90], %137 {strides = array<i32>} : memref<9x4x256xf32, #tpu.memory_space<vmem>>, vector<1x4x256xf32>,
      %c8_91 = arith.constant 8 : index
      %c0_92 = arith.constant 0 : index
      %c0_93 = arith.constant 0 : index
      %138 = vector.load %arg3[%c8_91, %c0_92, %c0_93] : memref<9x4x1xf32, #tpu.memory_space<vmem>>, vector<1x4x1xf32>
      %139 = vector.shape_cast %138 : vector<1x4x1xf32> to vector<4x1xf32>
      %c8_94 = arith.constant 8 : index
      %c0_95 = arith.constant 0 : index
      %140 = vector.load %arg4[%c8_94, %c0_95] : memref<9x256xf32, #tpu.memory_space<vmem>>, vector<1x256xf32>
      %141 = vector.broadcast %139 : vector<4x1xf32> to vector<4x256xf32>
      %142 = vector.broadcast %140 : vector<1x256xf32> to vector<4x256xf32>
      %143 = arith.mulf %141, %142 : vector<4x256xf32>
      %c8_96 = arith.constant 8 : index
      %c0_97 = arith.constant 0 : index
      %c0_98 = arith.constant 0 : index
      %144 = vector.load %arg7[%c8_96, %c0_97, %c0_98] : memref<9x4x256xf32, #tpu.memory_space<vmem>>, vector<1x4x256xf32>
      %145 = vector.shape_cast %144 : vector<1x4x256xf32> to vector<4x256xf32>
      %146 = vector.shape_cast %143 : vector<4x256xf32> to vector<1x4x256xf32>
      tpu.vector_store %arg7[%c8_96, %c0_97, %c0_98], %146 {strides = array<i32>} : memref<9x4x256xf32, #tpu.memory_space<vmem>>, vector<1x4x256xf32>,
    } else {
    }
    %c0 = arith.constant 0 : index
    %c0_1 = arith.constant 0 : index
    %c0_2 = arith.constant 0 : index
    %3 = vector.load %arg2[%c0, %c0_1, %c0_2] : memref<2x4x256xf32, #tpu.memory_space<vmem>>, vector<2x4x256xf32>
    %c1_i32 = arith.constant 1 : i32
    %4 = tpu.dynamic_rotate %3 by %c1_i32 dim 2 : vector<2x4x256xf32>, i32 -> vector<2x4x256xf32>
    %c255_i32 = arith.constant 255 : i32
    %5 = tpu.dynamic_rotate %3 by %c255_i32 dim 2 : vector<2x4x256xf32>, i32 -> vector<2x4x256xf32>
    %c0_3 = arith.constant 0 : index
    %c0_4 = arith.constant 0 : index
    %c0_5 = arith.constant 0 : index
    %6 = vector.load %arg7[%c0_3, %c0_4, %c0_5] : memref<9x4x256xf32, #tpu.memory_space<vmem>>, vector<1x4x256xf32>
    %7 = vector.shape_cast %6 : vector<1x4x256xf32> to vector<4x256xf32>
    %8 = vector.shape_cast %7 : vector<4x256xf32> to vector<1x4x256xf32>
    %9 = vector.broadcast %8 : vector<1x4x256xf32> to vector<2x4x256xf32>
    %10 = arith.mulf %4, %9 : vector<2x4x256xf32>
    %c1 = arith.constant 1 : index
    %c0_6 = arith.constant 0 : index
    %c0_7 = arith.constant 0 : index
    %11 = vector.load %arg7[%c1, %c0_6, %c0_7] : memref<9x4x256xf32, #tpu.memory_space<vmem>>, vector<1x4x256xf32>
    %12 = vector.shape_cast %11 : vector<1x4x256xf32> to vector<4x256xf32>
    %13 = vector.shape_cast %12 : vector<4x256xf32> to vector<1x4x256xf32>
    %14 = vector.broadcast %13 : vector<1x4x256xf32> to vector<2x4x256xf32>
    %15 = arith.mulf %3, %14 : vector<2x4x256xf32>
    %16 = arith.addf %10, %15 : vector<2x4x256xf32>
    %c2 = arith.constant 2 : index
    %c0_8 = arith.constant 0 : index
    %c0_9 = arith.constant 0 : index
    %17 = vector.load %arg7[%c2, %c0_8, %c0_9] : memref<9x4x256xf32, #tpu.memory_space<vmem>>, vector<1x4x256xf32>
    %18 = vector.shape_cast %17 : vector<1x4x256xf32> to vector<4x256xf32>
    %19 = vector.shape_cast %18 : vector<4x256xf32> to vector<1x4x256xf32>
    %20 = vector.broadcast %19 : vector<1x4x256xf32> to vector<2x4x256xf32>
    %21 = arith.mulf %5, %20 : vector<2x4x256xf32>
    %22 = arith.addf %16, %21 : vector<2x4x256xf32>
    %c3 = arith.constant 3 : index
    %c0_10 = arith.constant 0 : index
    %c0_11 = arith.constant 0 : index
    %23 = vector.load %arg7[%c3, %c0_10, %c0_11] : memref<9x4x256xf32, #tpu.memory_space<vmem>>, vector<1x4x256xf32>
    %24 = vector.shape_cast %23 : vector<1x4x256xf32> to vector<4x256xf32>
    %25 = vector.shape_cast %24 : vector<4x256xf32> to vector<1x4x256xf32>
    %26 = vector.broadcast %25 : vector<1x4x256xf32> to vector<2x4x256xf32>
    %27 = arith.mulf %4, %26 : vector<2x4x256xf32>
    %c4 = arith.constant 4 : index
    %c0_12 = arith.constant 0 : index
    %c0_13 = arith.constant 0 : index
    %28 = vector.load %arg7[%c4, %c0_12, %c0_13] : memref<9x4x256xf32, #tpu.memory_space<vmem>>, vector<1x4x256xf32>
    %29 = vector.shape_cast %28 : vector<1x4x256xf32> to vector<4x256xf32>
    %30 = vector.shape_cast %29 : vector<4x256xf32> to vector<1x4x256xf32>
    %31 = vector.broadcast %30 : vector<1x4x256xf32> to vector<2x4x256xf32>
    %32 = arith.mulf %3, %31 : vector<2x4x256xf32>
    %33 = arith.addf %27, %32 : vector<2x4x256xf32>
    %c5 = arith.constant 5 : index
    %c0_14 = arith.constant 0 : index
    %c0_15 = arith.constant 0 : index
    %34 = vector.load %arg7[%c5, %c0_14, %c0_15] : memref<9x4x256xf32, #tpu.memory_space<vmem>>, vector<1x4x256xf32>
    %35 = vector.shape_cast %34 : vector<1x4x256xf32> to vector<4x256xf32>
    %36 = vector.shape_cast %35 : vector<4x256xf32> to vector<1x4x256xf32>
    %37 = vector.broadcast %36 : vector<1x4x256xf32> to vector<2x4x256xf32>
    %38 = arith.mulf %5, %37 : vector<2x4x256xf32>
    %39 = arith.addf %33, %38 : vector<2x4x256xf32>
    %c6 = arith.constant 6 : index
    %c0_16 = arith.constant 0 : index
    %c0_17 = arith.constant 0 : index
    %40 = vector.load %arg7[%c6, %c0_16, %c0_17] : memref<9x4x256xf32, #tpu.memory_space<vmem>>, vector<1x4x256xf32>
    %41 = vector.shape_cast %40 : vector<1x4x256xf32> to vector<4x256xf32>
    %42 = vector.shape_cast %41 : vector<4x256xf32> to vector<1x4x256xf32>
    %43 = vector.broadcast %42 : vector<1x4x256xf32> to vector<2x4x256xf32>
    %44 = arith.mulf %4, %43 : vector<2x4x256xf32>
    %c7 = arith.constant 7 : index
    %c0_18 = arith.constant 0 : index
    %c0_19 = arith.constant 0 : index
    %45 = vector.load %arg7[%c7, %c0_18, %c0_19] : memref<9x4x256xf32, #tpu.memory_space<vmem>>, vector<1x4x256xf32>
    %46 = vector.shape_cast %45 : vector<1x4x256xf32> to vector<4x256xf32>
    %47 = vector.shape_cast %46 : vector<4x256xf32> to vector<1x4x256xf32>
    %48 = vector.broadcast %47 : vector<1x4x256xf32> to vector<2x4x256xf32>
    %49 = arith.mulf %3, %48 : vector<2x4x256xf32>
    %50 = arith.addf %44, %49 : vector<2x4x256xf32>
    %c8 = arith.constant 8 : index
    %c0_20 = arith.constant 0 : index
    %c0_21 = arith.constant 0 : index
    %51 = vector.load %arg7[%c8, %c0_20, %c0_21] : memref<9x4x256xf32, #tpu.memory_space<vmem>>, vector<1x4x256xf32>
    %52 = vector.shape_cast %51 : vector<1x4x256xf32> to vector<4x256xf32>
    %53 = vector.shape_cast %52 : vector<4x256xf32> to vector<1x4x256xf32>
    %54 = vector.broadcast %53 : vector<1x4x256xf32> to vector<2x4x256xf32>
    %55 = arith.mulf %5, %54 : vector<2x4x256xf32>
    %56 = arith.addf %50, %55 : vector<2x4x256xf32>
    %c16_i32 = arith.constant 16 : i32
    %57 = tpu.dynamic_rotate %22 by %c16_i32 dim 2 : vector<2x4x256xf32>, i32 -> vector<2x4x256xf32>
    %58 = arith.addf %39, %57 : vector<2x4x256xf32>
    %c240_i32 = arith.constant 240 : i32
    %59 = tpu.dynamic_rotate %56 by %c240_i32 dim 2 : vector<2x4x256xf32>, i32 -> vector<2x4x256xf32>
    %60 = arith.addf %58, %59 : vector<2x4x256xf32>
    %c0_22 = arith.constant 0 : index
    %c0_23 = arith.constant 0 : index
    %61 = vector.load %arg5[%c0_22, %c0_23] : memref<4x1xf32, #tpu.memory_space<vmem>>, vector<4x1xf32>
    %62 = vector.shape_cast %61 : vector<4x1xf32> to vector<1x4x1xf32>
    %63 = vector.broadcast %62 : vector<1x4x1xf32> to vector<2x4x256xf32>
    %64 = arith.addf %60, %63 : vector<2x4x256xf32>
    %c0_24 = arith.constant 0 : index
    %c0_25 = arith.constant 0 : index
    %c0_26 = arith.constant 0 : index
    %65 = vector.load %arg6[%c0_24, %c0_25, %c0_26] : memref<2x4x256xf32, #tpu.memory_space<vmem>>, vector<2x4x256xf32>
    tpu.vector_store %arg6[%c0_24, %c0_25, %c0_26], %64 {strides = array<i32>} : memref<2x4x256xf32, #tpu.memory_space<vmem>>, vector<2x4x256xf32>,
    return
  }
  func.func @transform_0(%arg0: i32, %arg1: i32) -> (i32, i32, i32) {
    %c0_i32 = arith.constant 0 : i32
    %c0_i32_0 = arith.constant 0 : i32
    return %arg1, %arg0, %c0_i32 : i32, i32, i32
  }
  func.func @transform_1(%arg0: i32, %arg1: i32) -> (i32, i32, i32) {
    %c0_i32 = arith.constant 0 : i32
    %c0_i32_0 = arith.constant 0 : i32
    %c0_i32_1 = arith.constant 0 : i32
    return %c0_i32, %arg0, %c0_i32_0 : i32, i32, i32
  }
  func.func @transform_2(%arg0: i32, %arg1: i32) -> (i32, i32) {
    %c0_i32 = arith.constant 0 : i32
    %c0_i32_0 = arith.constant 0 : i32
    %c0_i32_1 = arith.constant 0 : i32
    return %c0_i32, %c0_i32_0 : i32, i32
  }
  func.func @transform_3(%arg0: i32, %arg1: i32) -> (i32, i32) {
    %c0_i32 = arith.constant 0 : i32
    %c0_i32_0 = arith.constant 0 : i32
    return %arg0, %c0_i32 : i32, i32
  }
  func.func @transform_4(%arg0: i32, %arg1: i32) -> (i32, i32, i32) {
    %c0_i32 = arith.constant 0 : i32
    %c0_i32_0 = arith.constant 0 : i32
    return %arg1, %arg0, %c0_i32 : i32, i32, i32
  }
}

</mosaic_0001>

<bundles_post_ra>
// kernel: repvggdw_forward.2
= control target key start
LH: loop header
LB: loop body
LE: loop exit
PB: predicated region body
PF: predicated region fallthrough
CT: control target
= control target key end

     0   :  { %v564_v0 = vmov 0   ;;  %s565_s28 = smov 1   ;;  %v26_v11 = vlaneseq  ;;  %s568_s25 = smov 112   ;;  %vm444_vm2 = vcmask 1043456   ;;  %vm456_vm5 = vcmask 3072   ;;  %s860_s1 = inlined_call_operand.vmem [shape: f32[9,4,1], index: 1, kind: input, shape index: {}]   ;;  %s861_s0 = inlined_call_operand.vmem [shape: f32[2,4,256], index: 0, kind: input, shape index: {}]   ;;  %s862_s2 = inlined_call_operand.vmem [shape: f32[9,256], index: 2, kind: input, shape index: {}]   ;;  %s863_s3 = inlined_call_operand.vmem [shape: f32[1,4,8], index: 3, kind: output, shape index: {}]  }
   0x1   :  { %561 = vset.pattern.permute.xlu1 %v564_v0  ;;  %560 = vset.pattern.permute.xlu0 %v564_v0  ;;  %v544_v1 = vld [vmem:[%s860_s1 + $0x1c] sm:$0xf]  ;;  %v532_v2 = vld [vmem:[%s860_s1 + $0x4] sm:$0xf]  ;;  %v534_v3 = vld [vmem:[%s860_s1 + $0x8] sm:$0xf] }
   0x2   :  { %217 = vperm.xlu1 %561, %v544_v1   ;;  %49 = vperm.xlu0 %560, %v532_v2   ;;  %v18_v4 = vld [vmem:[%s860_s1] sm:$0xf]  ;;  %v542_v6 = vld [vmem:[%s860_s1 + $0x18] sm:$0xf]  ;;  %v611_v7 = vld [vmem:[%s861_s0 + $0x8] sm:$0xff]  ;;  %v27_v12 = vshrl.u32 %v26_v11, 7 }
   0x3   :  { %v546_v5 = vld [vmem:[%s860_s1 + $0x20] sm:$0xf]  ;;  %v622_v9 = vcombine.high %v611_v7, %v611_v7  ;;  %v536_v13 = vld [vmem:[%s860_s1 + $0xc] sm:$0xf]  ;;  %v538_v14 = vld [vmem:[%s860_s1 + $0x10] sm:$0xf] }
   0x4   :  { %v616_v8 = vld [vmem:[%s861_s0] sm:$0xff]  ;;  %s566_s0 = smov 127   ;;  %v640_v15 = vsub.s32 0, %v27_v12  ;;  %v642_v16 = vsub.s32 1, %v27_v12  ;;  %v540_v23 = vld [vmem:[%s860_s1 + $0x14] sm:$0xf] }
   0x5   :  { %v626_v10 = vcombine.high %v616_v8, %v616_v8  ;;  %v647_v17 = vld [vmem:[%s862_s2 + $0x3] ss:$8 sm:$0x3]  ;;  %v652_v18 = vld [vmem:[%s862_s2 + $0x4] ss:$8 sm:$0x3] }
   0x6   :  { %77 = vperm.xlu1 %561, %v534_v3   ;;  %22 = vperm.xlu0 %560, %v18_v4   ;;  %v112_v19 = vrot.slane %v647_v17, %v640_v15  ;;  %v116_v20 = vrot.slane %v647_v17, %v642_v16  ;;  %v140_v21 = vrot.slane %v652_v18, %v640_v15  ;;  %v668_v24 = vld [vmem:[%s862_s2 + $0x5] ss:$8 sm:$0x3]  ;;  %v545_v29 = vld [vmem:[%s862_s2 + $0x7] ss:$8 sm:$0x3] }
   0x7   :  { %v144_v22 = vrot.slane %v652_v18, %v642_v16  ;;  %v168_v25 = vrot.slane %v668_v24, %v640_v15  ;;  %v172_v26 = vrot.slane %v668_v24, %v642_v16  ;;  %v533_v30 = vld [vmem:[%s862_s2 + $0x1] ss:$8 sm:$0x3]  ;;  %v224_v33 = vrot.slane %v545_v29, %v640_v15  ;;  %v19_v43 = vld [vmem:[%s862_s2] ss:$8 sm:$0x3] }
   0x8   :  { %v228_v34 = vrot.slane %v545_v29, %v642_v16  ;;  %v56_v35 = vrot.slane %v533_v30, %v640_v15  ;;  %v60_v36 = vrot.slane %v533_v30, %v642_v16  ;;  %v535_v44 = vld [vmem:[%s862_s2 + $0x2] ss:$8 sm:$0x3]  ;;  %v547_v45 = vld [vmem:[%s862_s2 + $0x10] ss:$8 sm:$0x3]  ;;  %v29_v46 = vrot.slane %v19_v43, %v640_v15 }
   0x9   :  { %v33_v47 = vrot.slane %v19_v43, %v642_v16  ;;  %v543_v48 = vld [vmem:[%s862_s2 + $0x6] ss:$8 sm:$0x3]  ;;  %v698_v51 = vand.u32 127, %v26_v11  ;;  %v84_v54 = vrot.slane %v535_v44, %v640_v15  ;;  %v88_v55 = vrot.slane %v535_v44, %v642_v16  ;;  %s567_s2 = smov 16  }
   0xa   :  { %245 = vperm.xlu1 %561, %v546_v5   ;;  %189 = vperm.xlu0 %560, %v542_v6   ;;  %v252_v56 = vrot.slane %v547_v45, %v640_v15  ;;  %v196_v57 = vrot.slane %v543_v48, %v640_v15  ;;  %v200_v58 = vrot.slane %v543_v48, %v642_v16  ;;  %vm473_vm6 = vcmask 11272  }
   0xb   :  { %v256_v61 = vrot.slane %v547_v45, %v642_v16  ;;  %vm285_vm0 = vcmp.lt.s32.totalorder %v698_v51, 1  ;;  %vm298_vm1 = vcmp.lt.s32.totalorder %v698_v51, 127  ;;  %vm418_vm3 = vcmp.lt.s32.totalorder %v698_v51, 16 }
   0xc   :  { %vm435_vm4 = vcmp.lt.s32.totalorder %v698_v51, 112  ;;  %vm486_vm7 = vcmask 19472   ;;  %vm507_vm8 = vcmask 27672   ;;  %vm524_vm9 = vcmask 35872  }
   0xd   :  { %vm526_vm10 = vcmask 60456  }
   0xe   :  { %277 = vrot.lane.b32.xlu1 %v611_v7, %s565_s28  ;;  %275 = vrot.lane.b32.xlu0 %v616_v8, %s565_s28 }
  0x12   :  { %281 = vrot.lane.b32.xlu1 %v622_v9, %s565_s28  ;;  %279 = vrot.lane.b32.xlu0 %v626_v10, %s565_s28 }
  0x16   :  { %292 = vrot.lane.b32.xlu1 %v611_v7, %s566_s0  ;;  %290 = vrot.lane.b32.xlu0 %v616_v8, %s566_s0 }
  0x1a   :  { %296 = vrot.lane.b32.xlu1 %v622_v9, %s566_s0  ;;  %294 = vrot.lane.b32.xlu0 %v626_v10, %s566_s0 }
  0x1e   :  { %105 = vperm.xlu1 %561, %v536_v13   ;;  %133 = vperm.xlu0 %560, %v538_v14  }
  0x22   :  { %161 = vperm.xlu0 %560, %v540_v23  }
  0x81   :  { %v218_v27 = vpop.permute.xlu1 %217  ;;  %v50_v28 = vpop.permute.xlu0 %49 }
  0x82   :  { %v231_v39 = vmul.f32 %v224_v33, %v218_v27  ;;  %v232_v40 = vmul.f32 %v228_v34, %v218_v27  ;;  %v63_v41 = vmul.f32 %v56_v35, %v50_v28  ;;  %v64_v42 = vmul.f32 %v60_v36, %v50_v28 }
  0x84   :  { %v235_v52 = vcombine.low %v231_v39, %v232_v40  ;;  %v67_v53 = vcombine.low %v63_v41, %v64_v42 }
  0x85   :  { %v78_v31 = vpop.permute.xlu1 %77  ;;  %v23_v32 = vpop.permute.xlu0 %22 }
  0x86   :  { %v36_v59 = vmul.f32 %v29_v46, %v23_v32  ;;  %v37_v60 = vmul.f32 %v33_v47, %v23_v32  ;;  %v708_v0 = vmul.f32 %v616_v8, %v235_v52  ;;  %v711_v1 = vmul.f32 %v611_v7, %v235_v52 }
  0x87   :  { %v714_v2 = vmul.f32 %v616_v8, %v67_v53  ;;  %v717_v3 = vmul.f32 %v611_v7, %v67_v53  ;;  %v91_v4 = vmul.f32 %v84_v54, %v78_v31  ;;  %v92_v5 = vmul.f32 %v88_v55, %v78_v31 }
  0x88   :  { %v40_v13 = vcombine.low %v36_v59, %v37_v60  ;;  %v389_v30 = vcombine.high %v708_v0, %v708_v0  ;;  %v390_v31 = vcombine.high %v711_v1, %v711_v1 }
  0x89   :  { %v246_v37 = vpop.permute.xlu1 %245  ;;  %v190_v38 = vpop.permute.xlu0 %189  ;;  %v317_v32 = vcombine.high %v714_v2, %v714_v2  ;;  %v318_v33 = vcombine.high %v717_v3, %v717_v3  ;;  %v95_v34 = vcombine.low %v91_v4, %v92_v5 }
  0x8a   :  { %v203_v6 = vmul.f32 %v196_v57, %v190_v38  ;;  %v204_v11 = vmul.f32 %v200_v58, %v190_v38  ;;  %v259_v14 = vmul.f32 %v252_v56, %v246_v37  ;;  %v260_v23 = vmul.f32 %v256_v61, %v246_v37 }
  0x8b   :  { %v549_v37 = vcombine.low %v92_v5, %v92_v5  ;;  %v548_v38 = vcombine.low %v37_v60, %v37_v60 }
  0x8c   :  { %v207_v39 = vcombine.low %v203_v6, %v204_v11  ;;  %v263_v41 = vcombine.low %v259_v14, %v260_v23  ;;  %v553_v42 = vcombine.low %v260_v23, %v260_v23  ;;  %v552_v43 = vcombine.low %v204_v11, %v204_v11 }
  0x8d   :  { %v278_v49 = vpop.permute.xlu1 %277  ;;  %v276_v50 = vpop.permute.xlu0 %275 }
  0x91   :  { %v282_v62 = vpop.permute.xlu1 %281  ;;  %v280_v63 = vpop.permute.xlu0 %279 }
  0x92   :  { %v721_v12 = vsel %vm285_vm0, %v282_v62, %v278_v49  ;;  %v288_v27 = vsel %vm285_vm0, %v280_v63, %v276_v50  ;;  %v287_v35 = vsel %vm285_vm0, %v278_v49, %v282_v62  ;;  %v286_v44 = vsel %vm285_vm0, %v276_v50, %v280_v63 }
  0x93   :  { %v309_v36 = vmul.f32 %v721_v12, %v40_v13  ;;  %v307_v40 = vmul.f32 %v288_v27, %v40_v13  ;;  %v310_v47 = vmul.f32 %v548_v38, %v287_v35  ;;  %v381_v48 = vmul.f32 %v721_v12, %v207_v39 }
  0x94   :  { %v382_v53 = vmul.f32 %v552_v43, %v287_v35  ;;  %v379_v54 = vmul.f32 %v288_v27, %v207_v39  ;;  %v308_v57 = vmul.f32 %v548_v38, %v286_v44  ;;  %v380_v14 = vmul.f32 %v552_v43, %v286_v44 }
  0x95   :  { %v293_v28 = vpop.permute.xlu1 %292  ;;  %v291_v29 = vpop.permute.xlu0 %290  ;;  %v323_v56 = vadd.f32 %v717_v3, %v309_v36  ;;  %v321_v59 = vadd.f32 %v714_v2, %v307_v40 }
  0x99   :  { %v297_v45 = vpop.permute.xlu1 %296  ;;  %v295_v46 = vpop.permute.xlu0 %294 }
  0x9a   :  { %v300_v49 = vsel %vm298_vm1, %v293_v28, %v297_v45  ;;  %v299_v52 = vsel %vm298_vm1, %v291_v29, %v295_v46  ;;  %v302_v50 = vsel %vm298_vm1, %v297_v45, %v293_v28  ;;  %v301_v61 = vsel %vm298_vm1, %v295_v46, %v291_v29 }
  0x9b   :  { %v332_v55 = vmul.f32 %v300_v49, %v95_v34  ;;  %v330_v58 = vmul.f32 %v299_v52, %v95_v34  ;;  %v404_v60 = vmul.f32 %v300_v49, %v263_v41  ;;  %v402_v62 = vmul.f32 %v299_v52, %v263_v41 }
  0x9c   :  { %v395_v28 = vadd.f32 %v711_v1, %v381_v48  ;;  %v333_v29 = vmul.f32 %v549_v37, %v302_v50  ;;  %v331_v36 = vmul.f32 %v549_v37, %v301_v61  ;;  %v403_v16 = vmul.f32 %v553_v42, %v301_v61 }
  0x9d   :  { %v106_v63 = vpop.permute.xlu1 %105  ;;  %v134_v4 = vpop.permute.xlu0 %133  ;;  %v336_v5 = vadd.f32 %v332_v55, %v323_v56  ;;  %v334_v23 = vadd.f32 %v330_v58, %v321_v59 }
  0x9e   :  { %v119_v6 = vmul.f32 %v112_v19, %v106_v63  ;;  %v120_v3 = vmul.f32 %v116_v20, %v106_v63  ;;  %v147_v11 = vmul.f32 %v140_v21, %v134_v4  ;;  %v148_v13 = vmul.f32 %v144_v22, %v134_v4 }
  0x9f   :  { %412 = vrot.lane.b32.xlu0 %v336_v5, %s567_s2  ;;  %v393_v19 = vadd.f32 %v708_v0, %v379_v54  ;;  %410 = vrot.lane.b32.xlu1 %v334_v23, %s567_s2  ;;  %v408_v38 = vadd.f32 %v404_v60, %v395_v28  ;;  %v324_v22 = vadd.f32 %v318_v33, %v310_v47  ;;  %v478_v0 = vsel %vm444_vm2, %v626_v10, 0.0 }
  0xa0   :  { %v123_v17 = vcombine.low %v119_v6, %v120_v3  ;;  %v550_v20 = vcombine.low %v120_v3, %v120_v3  ;;  %v151_v34 = vcombine.low %v147_v11, %v148_v13  ;;  %v488_v3 = vmul.f32 %v616_v8, %v616_v8 }
  0xa1   :  { %v162_v21 = vpop.permute.xlu0 %161  ;;  %v406_v18 = vadd.f32 %v402_v62, %v393_v19  ;;  %v337_v33 = vadd.f32 %v333_v29, %v324_v22  ;;  %v489_v11 = vmul.f32 %v611_v7, %v611_v7 }
  0xa2   :  { %v343_v39 = vmul.f32 %v288_v27, %v123_v17  ;;  %v344_v40 = vmul.f32 %v550_v20, %v286_v44  ;;  %v345_v41 = vmul.f32 %v721_v12, %v123_v17  ;;  %v346_v43 = vmul.f32 %v550_v20, %v287_v35 }
  0xa3   :  { %v349_v45 = vmul.f32 %v616_v8, %v151_v34  ;;  %v350_v46 = vmul.f32 %v611_v7, %v151_v34  ;;  %v175_v48 = vmul.f32 %v168_v25, %v162_v21  ;;  %v176_v37 = vmul.f32 %v172_v26, %v162_v21  ;;  %429 = vrot.lane.b32.xlu0 %v408_v38, %s568_s25 }
  0xa4   :  { %v405_v27 = vmul.f32 %v553_v42, %v302_v50  ;;  %v322_v12 = vadd.f32 %v317_v32, %v308_v57  ;;  %v396_v35 = vadd.f32 %v390_v31, %v382_v53  ;;  %427 = vrot.lane.b32.xlu1 %v406_v18, %s568_s25  ;;  %v394_v31 = vadd.f32 %v389_v30, %v380_v14 }
  0xa5   :  { %v353_v44 = vcombine.high %v349_v45, %v349_v45  ;;  %v354_v15 = vcombine.high %v350_v46, %v350_v46  ;;  %v179_v25 = vcombine.low %v175_v48, %v176_v37  ;;  %v551_v47 = vcombine.low %v176_v37, %v176_v37 }
  0xa6   :  { %v335_v24 = vadd.f32 %v331_v36, %v322_v12  ;;  %v357_v26 = vadd.f32 %v349_v45, %v343_v39  ;;  %v359_v54 = vadd.f32 %v350_v46, %v345_v41  ;;  %v409_v1 = vadd.f32 %v405_v27, %v396_v35 }
  0xa7   :  { %v366_v55 = vmul.f32 %v299_v52, %v179_v25  ;;  %v367_v56 = vmul.f32 %v551_v47, %v301_v61  ;;  %v368_v58 = vmul.f32 %v300_v49, %v179_v25  ;;  %v369_v59 = vmul.f32 %v551_v47, %v302_v50  ;;  %416 = vrot.lane.b32.xlu0 %v337_v33, %s567_s2 }
  0xa8   :  { %v358_v2 = vadd.f32 %v353_v44, %v344_v40  ;;  %v360_v32 = vadd.f32 %v354_v15, %v346_v43  ;;  %414 = vrot.lane.b32.xlu1 %v335_v24, %s567_s2  ;;  %v407_v52 = vadd.f32 %v403_v16, %v394_v31  ;;  %v475_v49 = vsel %vm444_vm2, %v616_v8, 0.0 }
  0xa9   :  { %v370_v53 = vadd.f32 %v366_v55, %v357_v26  ;;  %v372_v42 = vadd.f32 %v368_v58, %v359_v54  ;;  %v476_v50 = vsel %vm444_vm2, %v611_v7, 0.0  ;;  %v479_v30 = vsel %vm444_vm2, %v622_v9, 0.0 }
  0xaa   :  { %v371_v57 = vadd.f32 %v367_v56, %v358_v2  ;;  %v373_v60 = vadd.f32 %v369_v59, %v360_v32  ;;  %v477_v61 = vadd.f32 %v476_v50, %v475_v49  ;;  %v480_v62 = vadd.f32 %v479_v30, %v478_v0 }
  0xab   :  { %433 = vrot.lane.b32.xlu0 %v409_v1, %s568_s25  ;;  %v492_v23 = vcombine.high %v488_v3, %v488_v3  ;;  %v493_v28 = vcombine.high %v489_v11, %v489_v11  ;;  %v496_v17 = vsel %vm444_vm2, %v488_v3, 0.0  ;;  %v497_v20 = vsel %vm444_vm2, %v489_v11, 0.0 }
  0xac   :  { %431 = vrot.lane.b32.xlu1 %v407_v52, %s568_s25  ;;  %v481_v63 = vsel %vm444_vm2, %v477_v61, 0.0  ;;  %v482_v4 = vsel %vm444_vm2, %v480_v62, 0.0  ;;  %v498_v40 = vadd.f32 %v497_v20, %v496_v17 }
  0xad   :  { %v483_v5 = vadd.f32 %v482_v4, %v481_v63  ;;  %v499_v34 = vsel %vm444_vm2, %v492_v23, 0.0  ;;  %v500_v36 = vsel %vm444_vm2, %v493_v28, 0.0 }
  0xae   :  { %v501_v41 = vadd.f32 %v500_v36, %v499_v34  ;;  %v502_v47 = vsel %vm444_vm2, %v498_v40, 0.0 }
  0xb0   :  { %v503_v16 = vsel %vm444_vm2, %v501_v41, 0.0 }
  0xb1   :  { %v504_v23 = vadd.f32 %v503_v16, %v502_v47 }
  0xca   :  { %484 = vadd.xlane.f32.xlu0 %v483_v5 }
 0x111   :  { %v413_v6 = vpop.permute.xlu0 %412  ;;  %v411_v13 = vpop.permute.xlu1 %410 }
 0x115   :  { %v430_v14 = vpop.permute.xlu0 %429 }
 0x116   :  { %v428_v19 = vpop.permute.xlu1 %427 }
 0x119   :  { %v417_v29 = vpop.permute.xlu0 %416 }
 0x11a   :  { %v420_v21 = vsel %vm418_vm3, %v413_v6, %v417_v29  ;;  %v422_v38 = vsel %vm418_vm3, %v417_v29, %v413_v6  ;;  %v415_v18 = vpop.permute.xlu1 %414 }
 0x11b   :  { %v419_v22 = vsel %vm418_vm3, %v411_v13, %v415_v18  ;;  %v421_v39 = vsel %vm418_vm3, %v415_v18, %v411_v13  ;;  %v425_v43 = vadd.f32 %v422_v38, %v372_v42  ;;  %v426_v45 = vadd.f32 %v420_v21, %v373_v60 }
 0x11c   :  { %v423_v27 = vadd.f32 %v421_v39, %v370_v53  ;;  %v424_v33 = vadd.f32 %v419_v22, %v371_v57  ;;  %v569_v21 = vmov 0.0  }
 0x11d   :  { %v434_v46 = vpop.permute.xlu0 %433 }
 0x11e   :  { %v437_v48 = vsel %vm435_vm4, %v430_v14, %v434_v46  ;;  %v439_v37 = vsel %vm435_vm4, %v434_v46, %v430_v14  ;;  %v432_v12 = vpop.permute.xlu1 %431 }
 0x11f   :  { %v442_v35 = vadd.f32 %v437_v48, %v425_v43  ;;  %v443_v44 = vadd.f32 %v439_v37, %v426_v45  ;;  %v436_v15 = vsel %vm435_vm4, %v428_v19, %v432_v12  ;;  %v438_v25 = vsel %vm435_vm4, %v432_v12, %v428_v19 }
 0x120   :  { %v440_v24 = vadd.f32 %v436_v15, %v423_v27  ;;  %v441_v26 = vadd.f32 %v438_v25, %v424_v33 }
 0x121   :  { %v460_v54 = vmul.f32 %v442_v35, %v442_v35  ;;  %v461_v55 = vmul.f32 %v443_v44, %v443_v44  ;;  %v511_v56 = vmul.f32 %v442_v35, %v611_v7  ;;  %v512_v58 = vmul.f32 %v443_v44, %v622_v9 }
 0x122   :  { %v446_v59 = vsel %vm444_vm2, %v442_v35, 0.0  ;;  %v449_v2 = vsel %vm444_vm2, %v443_v44, 0.0  ;;  %v458_v32 = vmul.f32 %v440_v24, %v440_v24  ;;  %v459_v1 = vmul.f32 %v441_v26, %v441_v26 }
 0x123   :  { %v509_v51 = vmul.f32 %v440_v24, %v616_v8  ;;  %v510_v31 = vmul.f32 %v441_v26, %v626_v10  ;;  %v445_v53 = vsel %vm444_vm2, %v440_v24, 0.0  ;;  %v448_v42 = vsel %vm444_vm2, %v441_v26, 0.0 }
 0x124   :  { %v463_v57 = vsel %vm444_vm2, %v460_v54, 0.0  ;;  %v466_v7 = vsel %vm444_vm2, %v461_v55, 0.0  ;;  %v447_v60 = vadd.f32 %v446_v59, %v445_v53  ;;  %v450_v9 = vadd.f32 %v449_v2, %v448_v42 }
 0x125   :  { %v462_v52 = vsel %vm444_vm2, %v458_v32, 0.0  ;;  %v465_v49 = vsel %vm444_vm2, %v459_v1, 0.0  ;;  %v513_v8 = vsel %vm444_vm2, %v509_v51, 0.0  ;;  %v514_v10 = vsel %vm444_vm2, %v511_v56, 0.0 }
 0x126   :  { %v464_v50 = vadd.f32 %v463_v57, %v462_v52  ;;  %v467_v0 = vadd.f32 %v466_v7, %v465_v49  ;;  %v451_v30 = vsel %vm444_vm2, %v447_v60, 0.0  ;;  %v452_v61 = vsel %vm444_vm2, %v450_v9, 0.0 }
 0x127   :  { %v515_v62 = vadd.f32 %v514_v10, %v513_v8  ;;  %v516_v63 = vsel %vm444_vm2, %v510_v31, 0.0  ;;  %v453_v4 = vadd.f32 %v452_v61, %v451_v30  ;;  %v517_v3 = vsel %vm444_vm2, %v512_v58, 0.0 }
 0x128   :  { %v468_v5 = vsel %vm444_vm2, %v464_v50, 0.0  ;;  %v469_v6 = vsel %vm444_vm2, %v467_v0, 0.0  ;;  %v518_v13 = vadd.f32 %v517_v3, %v516_v63 }
 0x129   :  { %v470_v11 = vadd.f32 %v469_v6, %v468_v5  ;;  %v519_v14 = vsel %vm444_vm2, %v515_v62, 0.0  ;;  %454 = vadd.xlane.f32.xlu1 %v453_v4 }
 0x12a   :  { %v520_v28 = vsel %vm444_vm2, %v518_v13, 0.0 }
 0x12b   :  { %471 = vadd.xlane.f32.xlu0 %v470_v11  ;;  %v521_v19 = vadd.f32 %v520_v28, %v519_v14 }
 0x12d   :  { %505 = vadd.xlane.f32.xlu1 %v504_v23 }
 0x12f   :  { %522 = vadd.xlane.f32.xlu0 %v521_v19 }
 0x157   :  { %v485_v29 = vpop.xlane.xlu0 %484 }
 0x1b6   :  { %v455_v17 = vpop.xlane.xlu1 %454 }
 0x1b7   :  { %457 = vst.msk [vmem:[%s863_s3] sm:$0xf] %vm456_vm5, %v455_v17 }
 0x1b8   :  { %v472_v20 = vpop.xlane.xlu0 %471 }
 0x1b9   :  { %474 = vst.msk [vmem:[%s863_s3] sm:$0xf] %vm473_vm6, %v472_v20 }
 0x1ba   :  { %487 = vst.msk [vmem:[%s863_s3] sm:$0xf] %vm486_vm7, %v485_v29  ;;  %v506_v34 = vpop.xlane.xlu1 %505 }
 0x1bb   :  { %508 = vst.msk [vmem:[%s863_s3] sm:$0xf] %vm507_vm8, %v506_v34 }
 0x1bc   :  { %v523_v36 = vpop.xlane.xlu0 %522 }
 0x1bd   :  { %525 = vst.msk [vmem:[%s863_s3] sm:$0xf] %vm524_vm9, %v523_v36 }
 0x1be   :  { %527 = vst.msk [vmem:[%s863_s3] sm:$0xf] %vm526_vm10, %v569_v21 }

// kernel: repvggdw_forward.3
= control target key start
LH: loop header
LB: loop body
LE: loop exit
PB: predicated region body
PF: predicated region fallthrough
CT: control target
= control target key end

     0   :  { %v502_v0 = vmov 0   ;;  %s503_s5 = smov 1   ;;  %v29_v11 = vlaneseq  ;;  %s504_s6 = smov 127   ;;  %s735_s1 = inlined_call_operand.vmem [shape: f32[9,4,1], index: 1, kind: input, shape index: {}]   ;;  %s736_s0 = inlined_call_operand.vmem [shape: f32[2,4,256], index: 0, kind: input, shape index: {}]   ;;  %s737_s2 = inlined_call_operand.vmem [shape: f32[9,256], index: 2, kind: input, shape index: {}]   ;;  %s738_s3 = inlined_call_operand.vmem [shape: f32[4,1], index: 3, kind: input, shape index: {}]   ;;  %s739_s4 = inlined_call_operand.vmem [shape: f32[2,4,256], index: 4, kind: output, shape index: {}]  }
   0x1   :  { %499 = vset.pattern.permute.xlu1 %v502_v0  ;;  %498 = vset.pattern.permute.xlu0 %v502_v0  ;;  %v483_v1 = vld [vmem:[%s735_s1 + $0x1c] sm:$0xf]  ;;  %v471_v2 = vld [vmem:[%s735_s1 + $0x4] sm:$0xf]  ;;  %v473_v3 = vld [vmem:[%s735_s1 + $0x8] sm:$0xf] }
   0x2   :  { %220 = vperm.xlu1 %499, %v483_v1   ;;  %52 = vperm.xlu0 %498, %v471_v2   ;;  %v21_v4 = vld [vmem:[%s735_s1] sm:$0xf]  ;;  %v481_v6 = vld [vmem:[%s735_s1 + $0x18] sm:$0xf]  ;;  %v553_v7 = vld [vmem:[%s736_s0 + $0x8] sm:$0xff]  ;;  %v30_v12 = vshrl.u32 %v29_v11, 7 }
   0x3   :  { %v485_v5 = vld [vmem:[%s735_s1 + $0x20] sm:$0xf]  ;;  %v275_v9 = vcombine.high %v553_v7, %v553_v7  ;;  %v475_v13 = vld [vmem:[%s735_s1 + $0xc] sm:$0xf]  ;;  %v477_v14 = vld [vmem:[%s735_s1 + $0x10] sm:$0xf] }
   0x4   :  { %v558_v8 = vld [vmem:[%s736_s0] sm:$0xff]  ;;  %v574_v15 = vsub.s32 0, %v30_v12  ;;  %v576_v16 = vsub.s32 1, %v30_v12  ;;  %v479_v24 = vld [vmem:[%s735_s1 + $0x14] sm:$0xf]  ;;  %v635_v52 = vand.u32 127, %v29_v11 }
   0x5   :  { %v274_v10 = vcombine.high %v558_v8, %v558_v8  ;;  %v581_v17 = vld [vmem:[%s737_s2 + $0x3] ss:$8 sm:$0x3]  ;;  %v586_v18 = vld [vmem:[%s737_s2 + $0x4] ss:$8 sm:$0x3] }
   0x6   :  { %80 = vperm.xlu1 %499, %v473_v3   ;;  %25 = vperm.xlu0 %498, %v21_v4   ;;  %v115_v19 = vrot.slane %v581_v17, %v574_v15  ;;  %v119_v20 = vrot.slane %v581_v17, %v576_v16  ;;  %v143_v21 = vrot.slane %v586_v18, %v574_v15  ;;  %v447_v23 = vld [vmem:[%s738_s3] sm:$0xf]  ;;  %v605_v25 = vld [vmem:[%s737_s2 + $0x5] ss:$8 sm:$0x3]  ;;  %vm288_vm0 = vcmp.lt.s32.totalorder %v635_v52, 1 }
   0x7   :  { %v147_v22 = vrot.slane %v586_v18, %v576_v16  ;;  %v171_v26 = vrot.slane %v605_v25, %v574_v15  ;;  %v175_v27 = vrot.slane %v605_v25, %v576_v16  ;;  %v484_v30 = vld [vmem:[%s737_s2 + $0x7] ss:$8 sm:$0x3]  ;;  %v472_v31 = vld [vmem:[%s737_s2 + $0x1] ss:$8 sm:$0x3] }
   0x8   :  { %v227_v34 = vrot.slane %v484_v30, %v574_v15  ;;  %v231_v35 = vrot.slane %v484_v30, %v576_v16  ;;  %v59_v36 = vrot.slane %v472_v31, %v574_v15  ;;  %v63_v37 = vrot.slane %v472_v31, %v576_v16  ;;  %v22_v44 = vld [vmem:[%s737_s2] ss:$8 sm:$0x3]  ;;  %v474_v45 = vld [vmem:[%s737_s2 + $0x2] ss:$8 sm:$0x3] }
   0x9   :  { %v486_v46 = vld [vmem:[%s737_s2 + $0x10] ss:$8 sm:$0x3]  ;;  %v32_v47 = vrot.slane %v22_v44, %v574_v15  ;;  %v36_v48 = vrot.slane %v22_v44, %v576_v16  ;;  %v482_v49 = vld [vmem:[%s737_s2 + $0x6] ss:$8 sm:$0x3]  ;;  %v87_v55 = vrot.slane %v474_v45, %v574_v15  ;;  %v91_v56 = vrot.slane %v474_v45, %v576_v16 }
   0xa   :  { %248 = vperm.xlu1 %499, %v485_v5   ;;  %192 = vperm.xlu0 %498, %v481_v6   ;;  %v255_v57 = vrot.slane %v486_v46, %v574_v15  ;;  %v199_v58 = vrot.slane %v482_v49, %v574_v15  ;;  %v203_v59 = vrot.slane %v482_v49, %v576_v16  ;;  %vm301_vm1 = vcmp.lt.s32.totalorder %v635_v52, 127  ;;  %s505_s2 = smov 16   ;;  %s506_s30 = smov 112  }
   0xb   :  { %v259_v62 = vrot.slane %v486_v46, %v576_v16  ;;  %vm421_vm2 = vcmp.lt.s32.totalorder %v635_v52, 16  ;;  %vm438_vm3 = vcmp.lt.s32.totalorder %v635_v52, 112 }
   0xe   :  { %280 = vrot.lane.b32.xlu1 %v553_v7, %s503_s5  ;;  %278 = vrot.lane.b32.xlu0 %v558_v8, %s503_s5 }
  0x12   :  { %284 = vrot.lane.b32.xlu1 %v275_v9, %s503_s5  ;;  %282 = vrot.lane.b32.xlu0 %v274_v10, %s503_s5 }
  0x16   :  { %295 = vrot.lane.b32.xlu1 %v553_v7, %s504_s6  ;;  %293 = vrot.lane.b32.xlu0 %v558_v8, %s504_s6 }
  0x1a   :  { %299 = vrot.lane.b32.xlu1 %v275_v9, %s504_s6  ;;  %297 = vrot.lane.b32.xlu0 %v274_v10, %s504_s6 }
  0x1e   :  { %108 = vperm.xlu1 %499, %v475_v13   ;;  %136 = vperm.xlu0 %498, %v477_v14  }
  0x22   :  { %450 = vperm.xlu1 %499, %v447_v23   ;;  %164 = vperm.xlu0 %498, %v479_v24  }
  0x81   :  { %v221_v28 = vpop.permute.xlu1 %220  ;;  %v53_v29 = vpop.permute.xlu0 %52 }
  0x82   :  { %v234_v40 = vmul.f32 %v227_v34, %v221_v28  ;;  %v235_v41 = vmul.f32 %v231_v35, %v221_v28  ;;  %v66_v42 = vmul.f32 %v59_v36, %v53_v29  ;;  %v67_v43 = vmul.f32 %v63_v37, %v53_v29 }
  0x84   :  { %v238_v53 = vcombine.low %v234_v40, %v235_v41  ;;  %v70_v54 = vcombine.low %v66_v42, %v67_v43 }
  0x85   :  { %v81_v32 = vpop.permute.xlu1 %80  ;;  %v26_v33 = vpop.permute.xlu0 %25 }
  0x86   :  { %v39_v60 = vmul.f32 %v32_v47, %v26_v33  ;;  %v40_v61 = vmul.f32 %v36_v48, %v26_v33  ;;  %v645_v1 = vmul.f32 %v558_v8, %v238_v53  ;;  %v648_v2 = vmul.f32 %v553_v7, %v238_v53 }
  0x87   :  { %v651_v3 = vmul.f32 %v558_v8, %v70_v54  ;;  %v654_v4 = vmul.f32 %v553_v7, %v70_v54  ;;  %v94_v5 = vmul.f32 %v87_v55, %v81_v32  ;;  %v95_v6 = vmul.f32 %v91_v56, %v81_v32 }
  0x88   :  { %v43_v12 = vcombine.low %v39_v60, %v40_v61  ;;  %v392_v29 = vcombine.high %v645_v1, %v645_v1  ;;  %v393_v30 = vcombine.high %v648_v2, %v648_v2  ;;  %v487_v37 = vcombine.low %v40_v61, %v40_v61 }
  0x89   :  { %v249_v38 = vpop.permute.xlu1 %248  ;;  %v193_v39 = vpop.permute.xlu0 %192  ;;  %v320_v31 = vcombine.high %v651_v3, %v651_v3  ;;  %v321_v32 = vcombine.high %v654_v4, %v654_v4  ;;  %v98_v33 = vcombine.low %v94_v5, %v95_v6  ;;  %v488_v36 = vcombine.low %v95_v6, %v95_v6 }
  0x8a   :  { %v206_v9 = vmul.f32 %v199_v58, %v193_v39  ;;  %v207_v10 = vmul.f32 %v203_v59, %v193_v39  ;;  %v262_v13 = vmul.f32 %v255_v57, %v249_v38  ;;  %v263_v14 = vmul.f32 %v259_v62, %v249_v38 }
  0x8c   :  { %v210_v38 = vcombine.low %v206_v9, %v207_v10  ;;  %v266_v40 = vcombine.low %v262_v13, %v263_v14  ;;  %v492_v41 = vcombine.low %v263_v14, %v263_v14  ;;  %v491_v42 = vcombine.low %v207_v10, %v207_v10 }
  0x8d   :  { %v281_v50 = vpop.permute.xlu1 %280  ;;  %v279_v51 = vpop.permute.xlu0 %278 }
  0x91   :  { %v285_v63 = vpop.permute.xlu1 %284  ;;  %v283_v0 = vpop.permute.xlu0 %282 }
  0x92   :  { %v658_v11 = vsel %vm288_vm0, %v285_v63, %v281_v50  ;;  %v291_v23 = vsel %vm288_vm0, %v283_v0, %v279_v51  ;;  %v290_v34 = vsel %vm288_vm0, %v281_v50, %v285_v63  ;;  %v289_v43 = vsel %vm288_vm0, %v279_v51, %v283_v0 }
  0x93   :  { %v312_v35 = vmul.f32 %v658_v11, %v43_v12  ;;  %v310_v39 = vmul.f32 %v291_v23, %v43_v12  ;;  %v313_v46 = vmul.f32 %v487_v37, %v290_v34  ;;  %v384_v47 = vmul.f32 %v658_v11, %v210_v38 }
  0x94   :  { %v385_v50 = vmul.f32 %v491_v42, %v290_v34  ;;  %v382_v53 = vmul.f32 %v291_v23, %v210_v38  ;;  %v311_v56 = vmul.f32 %v487_v37, %v289_v43  ;;  %v383_v10 = vmul.f32 %v491_v42, %v289_v43 }
  0x95   :  { %v296_v24 = vpop.permute.xlu1 %295  ;;  %v294_v28 = vpop.permute.xlu0 %293  ;;  %v326_v55 = vadd.f32 %v654_v4, %v312_v35  ;;  %v324_v58 = vadd.f32 %v651_v3, %v310_v39  ;;  %v398_v13 = vadd.f32 %v648_v2, %v384_v47 }
  0x99   :  { %v300_v44 = vpop.permute.xlu1 %299  ;;  %v298_v45 = vpop.permute.xlu0 %297 }
  0x9a   :  { %v303_v48 = vsel %vm301_vm1, %v296_v24, %v300_v44  ;;  %v302_v49 = vsel %vm301_vm1, %v294_v28, %v298_v45  ;;  %v305_v51 = vsel %vm301_vm1, %v300_v44, %v296_v24  ;;  %v304_v60 = vsel %vm301_vm1, %v298_v45, %v294_v28 }
  0x9b   :  { %v335_v54 = vmul.f32 %v303_v48, %v98_v33  ;;  %v333_v57 = vmul.f32 %v302_v49, %v98_v33  ;;  %v407_v59 = vmul.f32 %v303_v48, %v266_v40  ;;  %v405_v61 = vmul.f32 %v302_v49, %v266_v40 }
  0x9c   :  { %v336_v14 = vmul.f32 %v488_v36, %v305_v51  ;;  %v334_v28 = vmul.f32 %v488_v36, %v304_v60  ;;  %v406_v16 = vmul.f32 %v492_v41, %v304_v60 }
  0x9d   :  { %v109_v62 = vpop.permute.xlu1 %108  ;;  %v137_v63 = vpop.permute.xlu0 %136  ;;  %v339_v0 = vadd.f32 %v335_v54, %v326_v55  ;;  %v337_v12 = vadd.f32 %v333_v57, %v324_v58  ;;  %v411_v33 = vadd.f32 %v407_v59, %v398_v13 }
  0x9e   :  { %v122_v5 = vmul.f32 %v115_v19, %v109_v62  ;;  %v123_v4 = vmul.f32 %v119_v20, %v109_v62  ;;  %v150_v6 = vmul.f32 %v143_v21, %v137_v63  ;;  %v151_v9 = vmul.f32 %v147_v22, %v137_v63 }
  0x9f   :  { %415 = vrot.lane.b32.xlu1 %v339_v0, %s505_s2  ;;  %v396_v19 = vadd.f32 %v645_v1, %v382_v53  ;;  %413 = vrot.lane.b32.xlu0 %v337_v12, %s505_s2  ;;  %v327_v22 = vadd.f32 %v321_v32, %v313_v46 }
  0xa0   :  { %v126_v17 = vcombine.low %v122_v5, %v123_v4  ;;  %v489_v20 = vcombine.low %v123_v4, %v123_v4  ;;  %v154_v24 = vcombine.low %v150_v6, %v151_v9 }
  0xa1   :  { %v165_v21 = vpop.permute.xlu0 %164  ;;  %v409_v18 = vadd.f32 %v405_v61, %v396_v19  ;;  %v340_v32 = vadd.f32 %v336_v14, %v327_v22 }
  0xa2   :  { %v346_v35 = vmul.f32 %v291_v23, %v126_v17  ;;  %v347_v37 = vmul.f32 %v489_v20, %v289_v43  ;;  %v348_v38 = vmul.f32 %v658_v11, %v126_v17  ;;  %v349_v39 = vmul.f32 %v489_v20, %v290_v34 }
  0xa3   :  { %v352_v40 = vmul.f32 %v558_v8, %v154_v24  ;;  %v353_v42 = vmul.f32 %v553_v7, %v154_v24  ;;  %v178_v44 = vmul.f32 %v171_v26, %v165_v21  ;;  %v179_v36 = vmul.f32 %v175_v27, %v165_v21  ;;  %432 = vrot.lane.b32.xlu1 %v411_v33, %s506_s30 }
  0xa4   :  { %v408_v23 = vmul.f32 %v492_v41, %v305_v51  ;;  %v325_v11 = vadd.f32 %v320_v31, %v311_v56  ;;  %v399_v7 = vadd.f32 %v393_v30, %v385_v50  ;;  %430 = vrot.lane.b32.xlu0 %v409_v18, %s506_s30  ;;  %v397_v30 = vadd.f32 %v392_v29, %v383_v10 }
  0xa5   :  { %v356_v8 = vcombine.high %v352_v40, %v352_v40  ;;  %v357_v15 = vcombine.high %v353_v42, %v353_v42  ;;  %v182_v26 = vcombine.low %v178_v44, %v179_v36  ;;  %v490_v34 = vcombine.low %v179_v36, %v179_v36 }
  0xa6   :  { %v338_v25 = vadd.f32 %v334_v28, %v325_v11  ;;  %v362_v27 = vadd.f32 %v353_v42, %v348_v38  ;;  %v360_v43 = vadd.f32 %v352_v40, %v346_v35  ;;  %v412_v2 = vadd.f32 %v408_v23, %v399_v7 }
  0xa7   :  { %v369_v45 = vmul.f32 %v302_v49, %v182_v26  ;;  %v370_v46 = vmul.f32 %v490_v34, %v304_v60  ;;  %v371_v47 = vmul.f32 %v303_v48, %v182_v26  ;;  %v372_v53 = vmul.f32 %v490_v34, %v305_v51  ;;  %419 = vrot.lane.b32.xlu1 %v340_v32, %s505_s2  ;;  %v451_v48 = vpop.permute.xlu1 %450 }
  0xa8   :  { %v363_v3 = vadd.f32 %v357_v15, %v349_v39  ;;  %v361_v31 = vadd.f32 %v356_v8, %v347_v37  ;;  %417 = vrot.lane.b32.xlu0 %v338_v25, %s505_s2  ;;  %v410_v49 = vadd.f32 %v406_v16, %v397_v30 }
  0xa9   :  { %v375_v50 = vadd.f32 %v371_v47, %v362_v27  ;;  %v373_v41 = vadd.f32 %v369_v45, %v360_v43 }
  0xaa   :  { %v376_v54 = vadd.f32 %v372_v53, %v363_v3  ;;  %v374_v55 = vadd.f32 %v370_v46, %v361_v31 }
  0xab   :  { %436 = vrot.lane.b32.xlu1 %v412_v2, %s506_s30 }
  0xac   :  { %434 = vrot.lane.b32.xlu0 %v410_v49, %s506_s30 }
 0x111   :  { %v416_v56 = vpop.permute.xlu1 %415  ;;  %v414_v51 = vpop.permute.xlu0 %413 }
 0x115   :  { %v433_v57 = vpop.permute.xlu1 %432 }
 0x116   :  { %v431_v58 = vpop.permute.xlu0 %430 }
 0x119   :  { %v420_v59 = vpop.permute.xlu1 %419 }
 0x11a   :  { %v423_v60 = vsel %vm421_vm2, %v416_v56, %v420_v59  ;;  %v425_v1 = vsel %vm421_vm2, %v420_v59, %v416_v56  ;;  %v418_v29 = vpop.permute.xlu0 %417 }
 0x11b   :  { %v422_v61 = vsel %vm421_vm2, %v414_v51, %v418_v29  ;;  %v424_v62 = vsel %vm421_vm2, %v418_v29, %v414_v51  ;;  %v428_v63 = vadd.f32 %v425_v1, %v375_v50  ;;  %v429_v0 = vadd.f32 %v423_v60, %v376_v54 }
 0x11c   :  { %v426_v9 = vadd.f32 %v424_v62, %v373_v41  ;;  %v427_v10 = vadd.f32 %v422_v61, %v374_v55 }
 0x11d   :  { %v437_v5 = vpop.permute.xlu1 %436 }
 0x11e   :  { %v440_v4 = vsel %vm438_vm3, %v433_v57, %v437_v5  ;;  %v442_v6 = vsel %vm438_vm3, %v437_v5, %v433_v57  ;;  %v435_v19 = vpop.permute.xlu0 %434 }
 0x11f   :  { %v445_v12 = vadd.f32 %v440_v4, %v428_v63  ;;  %v446_v13 = vadd.f32 %v442_v6, %v429_v0  ;;  %v439_v14 = vsel %vm438_vm3, %v431_v58, %v435_v19  ;;  %v441_v17 = vsel %vm438_vm3, %v435_v19, %v431_v58 }
 0x120   :  { %v443_v28 = vadd.f32 %v439_v14, %v426_v9  ;;  %v444_v21 = vadd.f32 %v441_v17, %v427_v10 }
 0x121   :  { %v455_v20 = vadd.f32 %v451_v48, %v445_v12  ;;  %v456_v24 = vadd.f32 %v451_v48, %v446_v13 }
 0x122   :  { %v453_v52 = vadd.f32 %v451_v48, %v443_v28  ;;  %v454_v18 = vadd.f32 %v451_v48, %v444_v21 }
 0x123   :  { %v462_v33 = vcombine.low %v455_v20, %v456_v24 }
 0x124   :  { %v461_v22 = vcombine.low %v453_v52, %v454_v18 }
 0x125   :  { %466 = vst [vmem:[%s739_s4 + $0x8] sm:$0xff] %v462_v33 }
 0x126   :  { %465 = vst [vmem:[%s739_s4] sm:$0xff] %v461_v22 }

</bundles_post_ra>
